<compile_context>
chip_gen: v5e
topology: v5e:2x2
jax: 0.10.0
libtpu: 0.0.40
codegen_flags: <defaults>
</compile_context>

<pallas_src>
import functools
import math

import jax
import jax.numpy as jnp
from jax.experimental import pallas as pl
from jax.experimental.pallas import tpu as pltpu


_MATMUL_DTYPE = jnp.bfloat16           # MXU operand dtype; accumulation is always f32.
_VMEM_LIMIT_BYTES = 48 * 1024 * 1024   # < v7x 64 MiB physical, > v5e 16 MiB default scoped limit.
_NEG_INF = -1e30                       # finite mask fill: no inf-inf NaN risk in the online softmax.


def _layer_norm(x, gamma, beta, eps=1e-5):
    mu = jnp.mean(x, axis=-1, keepdims=True)
    var = jnp.mean((x - mu) ** 2, axis=-1, keepdims=True)
    return (x - mu) * jax.lax.rsqrt(var + eps) * gamma + beta


def _transformer_layer_kernel(
    xq_ref, xk_ref,
    wq_ref, bq_ref, wk_ref, bk_ref, wv_ref, bv_ref,
    wo_ref, bo_ref,
    wf1_ref, bf1_ref, wf2_ref, bf2_ref,
    g1_ref, be1_ref, g2_ref, be2_ref,
    o_ref,
    q_scr, m_scr, l_scr, acc_scr,
    *, num_heads, d_heads, causal, tq, tk):
    f32 = jnp.float32
    H, dh = num_heads, d_heads
    qi = pl.program_id(1)
    ki = pl.program_id(2)
    nk = pl.num_programs(2)

    # ---- once per q-tile (ki == 0): reset online-softmax state, project Q (1/sqrt(dh) folded in) ----
    @pl.when(ki == 0)
    def _init():
        xq = xq_ref[0].astype(_MATMUL_DTYPE)                                      # (Tq, D)
        q = jnp.dot(xq, wq_ref[...], preferred_element_type=f32) + bq_ref[...]
        q = q * (1.0 / math.sqrt(dh))
        q_scr[...] = q.reshape(tq, H, dh).transpose(1, 0, 2).astype(q_scr.dtype)  # (H, Tq, dh)
        m_scr[...] = jnp.full(m_scr.shape, _NEG_INF, f32)
        l_scr[...] = jnp.zeros(l_scr.shape, f32)
        acc_scr[...] = jnp.zeros(acc_scr.shape, f32)

    # ---- per k-tile: project K/V and do one online-softmax accumulation step ----
    def _attend():
        xk = xk_ref[0].astype(_MATMUL_DTYPE)                                      # (Tk, D)
        k = jnp.dot(xk, wk_ref[...], preferred_element_type=f32) + bk_ref[...]
        v = jnp.dot(xk, wv_ref[...], preferred_element_type=f32) + bv_ref[...]
        k3 = k.reshape(tk, H, dh).transpose(1, 0, 2).astype(_MATMUL_DTYPE)        # (H, Tk, dh)
        v3 = v.reshape(tk, H, dh).transpose(1, 0, 2).astype(_MATMUL_DTYPE)

        s = jnp.einsum('hqd,hkd->hqk', q_scr[...], k3,
                       preferred_element_type=f32)                                # (H, Tq, Tk)
        if causal:
            q_idx = qi * tq + jax.lax.broadcasted_iota(jnp.int32, (tq, tk), 0)
            k_idx = ki * tk + jax.lax.broadcasted_iota(jnp.int32, (tq, tk), 1)
            s = jnp.where((k_idx > q_idx)[None, :, :], _NEG_INF, s)

        m_prev = m_scr[...]                                                        # (H, Tq, 1)
        m_new = jnp.maximum(m_prev, jnp.max(s, axis=-1, keepdims=True))
        alpha = jnp.exp(m_prev - m_new)
        p = jnp.exp(s - m_new)                                                     # f32 (EUP)
        l_scr[...] = alpha * l_scr[...] + jnp.sum(p, axis=-1, keepdims=True)
        acc_scr[...] = alpha * acc_scr[...] + jnp.einsum(
            'hqk,hkd->hqd', p.astype(_MATMUL_DTYPE), v3, preferred_element_type=f32)
        m_scr[...] = m_new

    if causal:
        # Skip key tiles that are entirely above the diagonal for this q-tile.
        pl.when(ki * tk < (qi + 1) * tq)(_attend)
    else:
        _attend()

    # ---- once per q-tile (last k step): normalize, merge heads, project, FFN, LayerNorms ----
    @pl.when(ki == nk - 1)
    def _finalize():
        att = acc_scr[...] * pl.reciprocal(l_scr[...], approx=True)                # (H, Tq, dh)
        att_m = att.transpose(1, 0, 2).reshape(tq, H * dh)                         # (Tq, d_internal)
        x = xq_ref[0]                                                              # (Tq, D) f32 residual
        att_proj = jnp.dot(att_m.astype(_MATMUL_DTYPE), wo_ref[...],
                           preferred_element_type=f32) + bo_ref[...]
        y1 = _layer_norm(att_proj + x, g1_ref[...], be1_ref[...])

        h1 = jnp.maximum(
            jnp.dot(y1.astype(_MATMUL_DTYPE), wf1_ref[...], preferred_element_type=f32)
            + bf1_ref[...], 0.0)
        ff = jnp.dot(h1.astype(_MATMUL_DTYPE), wf2_ref[...],
                     preferred_element_type=f32) + bf2_ref[...]
        y2 = _layer_norm(ff + y1, g2_ref[...], be2_ref[...])
        o_ref[0] = y2.astype(o_ref.dtype)


_PARAM_ORDER = ("wq", "bq", "wk", "bk", "wv", "bv", "wo", "bo",
                "wf1", "bf1", "wf2", "bf2", "g1", "be1", "g2", "be2")
_MATMUL_WEIGHTS = ("wq", "wk", "wv", "wo", "wf1", "wf2")


def transformer_layer_mh(x, params, *, num_heads, causal, q_tile=None, k_tile=None):
    """x: (B, S, d_model) f32. params: pre-transposed Linear weights (in, out), biases (1, out)."""
    B, S, D = x.shape
    d_internal = params["wq"].shape[1]
    assert d_internal % num_heads == 0, "d_internal must be divisible by num_heads"
    d_heads = d_internal // num_heads

    tq = q_tile if q_tile is not None else min(S, 128)
    tk = k_tile if k_tile is not None else min(S, 128)
    assert S % tq == 0 and S % tk == 0, "seq_len must be divisible by the q/k tile sizes"

    # Matmul weights are MXU bf16 operands; biases / LN params stay f32.
    kp = {n: (params[n].astype(_MATMUL_DTYPE) if n in _MATMUL_WEIGHTS else params[n])
          for n in _PARAM_ORDER}
    plist = [kp[n] for n in _PARAM_ORDER]

    kernel = functools.partial(
        _transformer_layer_kernel,
        num_heads=num_heads, d_heads=d_heads, causal=causal, tq=tq, tk=tk)

    # Constant operands: whole array resident in VMEM, fetched once, not double-buffered.
    resident = pl.BlockSpec(memory_space=pltpu.MemorySpace.VMEM)

    return pl.pallas_call(
        kernel,
        out_shape=jax.ShapeDtypeStruct((B, S, D), x.dtype),
        grid=(B, S // tq, S // tk),
        in_specs=[
            pl.BlockSpec((1, tq, D), lambda b, qi, ki: (b, qi, 0)),   # query rows / residual
            pl.BlockSpec((1, tk, D), lambda b, qi, ki: (b, ki, 0)),   # key / value rows
        ] + [resident] * len(plist),
        out_specs=pl.BlockSpec((1, tq, D), lambda b, qi, ki: (b, qi, 0)),
        scratch_shapes=[
            pltpu.VMEM((num_heads, tq, d_heads), _MATMUL_DTYPE),      # scaled Q for this q-tile
            pltpu.VMEM((num_heads, tq, 1), jnp.float32),              # running max
            pltpu.VMEM((num_heads, tq, 1), jnp.float32),              # running denominator
            pltpu.VMEM((num_heads, tq, d_heads), jnp.float32),        # unnormalized PV accumulator
        ],
        compiler_params=pltpu.CompilerParams(
            dimension_semantics=("parallel", "parallel", "arbitrary"),
            vmem_limit_bytes=_VMEM_LIMIT_BYTES,
        ),
    )(x, x, *plist)


def reference(x, p, *, num_heads, causal):
    # Pure-JAX f32 mirror of the PyTorch forward (K@Q^T / softmax(dim=-2) orientation).
    B, S, D = x.shape
    d_internal = p["wq"].shape[1]
    dh = d_internal // num_heads
    q = (x @ p["wq"] + p["bq"]).reshape(B, S, num_heads, dh).transpose(0, 2, 1, 3)
    k = (x @ p["wk"] + p["bk"]).reshape(B, S, num_heads, dh).transpose(0, 2, 1, 3)
    v = (x @ p["wv"] + p["bv"]).reshape(B, S, num_heads, dh).transpose(0, 2, 1, 3)
    logits = jnp.einsum("bhkd,bhqd->bhkq", k, q) / math.sqrt(dh)
    if causal:
        ki = jnp.arange(S)[:, None]
        qi = jnp.arange(S)[None, :]
        logits = jnp.where(ki > qi, -jnp.inf, logits)
    w = jax.nn.softmax(logits, axis=-2)
    att = jnp.einsum("bhkq,bhkd->bhqd", w, v)
    att = att.transpose(0, 2, 1, 3).reshape(B, S, d_internal)

    def ln(y, g, b):
        mu = jnp.mean(y, -1, keepdims=True)
        var = jnp.mean((y - mu) ** 2, -1, keepdims=True)
        return (y - mu) / jnp.sqrt(var + 1e-5) * g + b

    y1 = ln(att @ p["wo"] + p["bo"] + x, p["g1"], p["be1"])
    ff = jnp.maximum(y1 @ p["wf1"] + p["bf1"], 0.0) @ p["wf2"] + p["bf2"]
    return ln(ff + y1, p["g2"], p["be2"])


if __name__ == "__main__":
    B, S, d_model, d_internal, num_heads = 2, 8, 32, 32, 4
    causal = True

    key = jax.random.PRNGKey(0)
    keys = jax.random.split(key, 14)

    def rnd(k, shape, scale=0.1):
        return (scale * jax.random.normal(k, shape)).astype(jnp.float32)

    params = dict(
        wq=rnd(keys[0], (d_model, d_internal)), bq=rnd(keys[1], (1, d_internal)),
        wk=rnd(keys[2], (d_model, d_internal)), bk=rnd(keys[3], (1, d_internal)),
        wv=rnd(keys[4], (d_model, d_internal)), bv=rnd(keys[5], (1, d_internal)),
        wo=rnd(keys[6], (d_internal, d_model)), bo=rnd(keys[7], (1, d_model)),
        wf1=rnd(keys[8], (d_model, 2 * d_model)), bf1=rnd(keys[9], (1, 2 * d_model)),
        wf2=rnd(keys[10], (2 * d_model, d_model)), bf2=rnd(keys[11], (1, d_model)),
        g1=jnp.ones((1, d_model), jnp.float32), be1=jnp.zeros((1, d_model), jnp.float32),
        g2=jnp.ones((1, d_model), jnp.float32), be2=jnp.zeros((1, d_model), jnp.float32),
    )
    x = rnd(keys[12], (B, S, d_model), scale=1.0)

    out = transformer_layer_mh(x, params, num_heads=num_heads, causal=causal)
    out = jax.block_until_ready(out)

    ref = reference(x, params, num_heads=num_heads, causal=causal)
    max_err = float(jnp.max(jnp.abs(out - ref)))
    # bf16 MXU operands + approx reciprocal through 5 matmuls + 2 LayerNorms vs. an f32 reference;
    # the tolerance reflects bf16 quantization noise, and still catches any structural error (O(1)).
    assert jnp.allclose(out, ref, atol=1e-1, rtol=1e-1), f"max abs err {max_err}"

    print("KERNEL_OK")
</pallas_src>

<mosaic_0001>
module attributes {stable_mosaic.version = 11 : i64} {
  func.func @_transformer_layer_kernel(%arg0: i32, %arg1: i32, %arg2: i32, %arg3: memref<1x8x32xf32, #tpu.memory_space<vmem>>, %arg4: memref<1x8x32xf32, #tpu.memory_space<vmem>>, %arg5: memref<32x32xbf16, #tpu.memory_space<vmem>>, %arg6: memref<1x32xf32, #tpu.memory_space<vmem>>, %arg7: memref<32x32xbf16, #tpu.memory_space<vmem>>, %arg8: memref<1x32xf32, #tpu.memory_space<vmem>>, %arg9: memref<32x32xbf16, #tpu.memory_space<vmem>>, %arg10: memref<1x32xf32, #tpu.memory_space<vmem>>, %arg11: memref<32x32xbf16, #tpu.memory_space<vmem>>, %arg12: memref<1x32xf32, #tpu.memory_space<vmem>>, %arg13: memref<32x64xbf16, #tpu.memory_space<vmem>>, %arg14: memref<1x64xf32, #tpu.memory_space<vmem>>, %arg15: memref<64x32xbf16, #tpu.memory_space<vmem>>, %arg16: memref<1x32xf32, #tpu.memory_space<vmem>>, %arg17: memref<1x32xf32, #tpu.memory_space<vmem>>, %arg18: memref<1x32xf32, #tpu.memory_space<vmem>>, %arg19: memref<1x32xf32, #tpu.memory_space<vmem>>, %arg20: memref<1x32xf32, #tpu.memory_space<vmem>>, %arg21: memref<1x8x32xf32, #tpu.memory_space<vmem>>, %arg22: memref<4x8x8xbf16, #tpu.memory_space<vmem>>, %arg23: memref<4x8x1xf32, #tpu.memory_space<vmem>>, %arg24: memref<4x8x1xf32, #tpu.memory_space<vmem>>, %arg25: memref<4x8x8xf32, #tpu.memory_space<vmem>>) attributes {dimension_semantics = [#tpu.dimension_semantics<parallel>, #tpu.dimension_semantics<parallel>, #tpu.dimension_semantics<arbitrary>], iteration_bounds = array<i64: 2, 1, 1>, scalar_prefetch = 0 : i64, scratch_operands = 4 : i64, tpu.core_type = #tpu.core_type<tc>, window_params = [{transform_indices = @transform_0, window_bounds = array<i64: 1, 8, 32>}, {transform_indices = @transform_1, window_bounds = array<i64: 1, 8, 32>}, {pipeline_mode = #tpu.pipeline_mode<synchronous>, transform_indices = @transform_2, window_bounds = array<i64: 32, 32>}, {pipeline_mode = #tpu.pipeline_mode<synchronous>, transform_indices = @transform_3, window_bounds = array<i64: 1, 32>}, {pipeline_mode = #tpu.pipeline_mode<synchronous>, transform_indices = @transform_4, window_bounds = array<i64: 32, 32>}, {pipeline_mode = #tpu.pipeline_mode<synchronous>, transform_indices = @transform_5, window_bounds = array<i64: 1, 32>}, {pipeline_mode = #tpu.pipeline_mode<synchronous>, transform_indices = @transform_6, window_bounds = array<i64: 32, 32>}, {pipeline_mode = #tpu.pipeline_mode<synchronous>, transform_indices = @transform_7, window_bounds = array<i64: 1, 32>}, {pipeline_mode = #tpu.pipeline_mode<synchronous>, transform_indices = @transform_8, window_bounds = array<i64: 32, 32>}, {pipeline_mode = #tpu.pipeline_mode<synchronous>, transform_indices = @transform_9, window_bounds = array<i64: 1, 32>}, {pipeline_mode = #tpu.pipeline_mode<synchronous>, transform_indices = @transform_10, window_bounds = array<i64: 32, 64>}, {pipeline_mode = #tpu.pipeline_mode<synchronous>, transform_indices = @transform_11, window_bounds = array<i64: 1, 64>}, {pipeline_mode = #tpu.pipeline_mode<synchronous>, transform_indices = @transform_12, window_bounds = array<i64: 64, 32>}, {pipeline_mode = #tpu.pipeline_mode<synchronous>, transform_indices = @transform_13, window_bounds = array<i64: 1, 32>}, {pipeline_mode = #tpu.pipeline_mode<synchronous>, transform_indices = @transform_14, window_bounds = array<i64: 1, 32>}, {pipeline_mode = #tpu.pipeline_mode<synchronous>, transform_indices = @transform_15, window_bounds = array<i64: 1, 32>}, {pipeline_mode = #tpu.pipeline_mode<synchronous>, transform_indices = @transform_16, window_bounds = array<i64: 1, 32>}, {pipeline_mode = #tpu.pipeline_mode<synchronous>, transform_indices = @transform_17, window_bounds = array<i64: 1, 32>}, {transform_indices = @transform_18, window_bounds = array<i64: 1, 8, 32>}]} {
    %c0_i32 = arith.constant 0 : i32
    %0 = arith.cmpi eq, %arg2, %c0_i32 : i32
    %1 = arith.extui %0 : i1 to i32
    %c0_i32_0 = arith.constant 0 : i32
    %2 = arith.cmpi ne, %1, %c0_i32_0 : i32
    scf.if %2 {
      %c0 = arith.constant 0 : index
      %c0_5 = arith.constant 0 : index
      %c0_6 = arith.constant 0 : index
      %12 = vector.load %arg3[%c0, %c0_5, %c0_6] : memref<1x8x32xf32, #tpu.memory_space<vmem>>, vector<1x8x32xf32>
      %13 = vector.shape_cast %12 : vector<1x8x32xf32> to vector<8x32xf32>
      %14 = arith.truncf %13 : vector<8x32xf32> to vector<8x32xbf16>
      %c0_7 = arith.constant 0 : index
      %c0_8 = arith.constant 0 : index
      %15 = vector.load %arg5[%c0_7, %c0_8] : memref<32x32xbf16, #tpu.memory_space<vmem>>, vector<32x32xbf16>
      %cst = arith.constant dense<0.000000e+00> : vector<8x32xf32>
      %16 = tpu.matmul %14, %15, %cst {dimension_numbers = #tpu.dot_dimension_numbers<[1], [0], [0], [1], [0, 0, 1, 1], [], []>} : vector<8x32xbf16>, vector<32x32xbf16>, vector<8x32xf32> -> vector<8x32xf32>
      %c0_9 = arith.constant 0 : index
      %c0_10 = arith.constant 0 : index
      %17 = vector.load %arg6[%c0_9, %c0_10] : memref<1x32xf32, #tpu.memory_space<vmem>>, vector<1x32xf32>
      %18 = vector.broadcast %17 : vector<1x32xf32> to vector<8x32xf32>
      %19 = arith.addf %16, %18 : vector<8x32xf32>
      %cst_11 = arith.constant 0.353553385 : f32
      %20 = vector.broadcast %cst_11 : f32 to vector<8x32xf32>
      %21 = arith.mulf %19, %20 : vector<8x32xf32>
      %22 = vector.shape_cast %21 : vector<8x32xf32> to vector<8x4x8xf32>
      %23 = tpu.transpose %22, [1, 0, 2] : vector<8x4x8xf32> -> vector<4x8x8xf32>
      %24 = arith.truncf %23 : vector<4x8x8xf32> to vector<4x8x8xbf16>
      %c0_12 = arith.constant 0 : index
      %c0_13 = arith.constant 0 : index
      %c0_14 = arith.constant 0 : index
      %25 = vector.load %arg22[%c0_12, %c0_13, %c0_14] : memref<4x8x8xbf16, #tpu.memory_space<vmem>>, vector<4x8x8xbf16>
      tpu.vector_store %arg22[%c0_12, %c0_13, %c0_14], %24 {strides = array<i32>} : memref<4x8x8xbf16, #tpu.memory_space<vmem>>, vector<4x8x8xbf16>,
      %cst_15 = arith.constant -1.000000e+30 : f32
      %26 = vector.broadcast %cst_15 : f32 to vector<4x8x1xf32>
      %c0_16 = arith.constant 0 : index
      %c0_17 = arith.constant 0 : index
      %c0_18 = arith.constant 0 : index
      %27 = vector.load %arg23[%c0_16, %c0_17, %c0_18] : memref<4x8x1xf32, #tpu.memory_space<vmem>>, vector<4x8x1xf32>
      tpu.vector_store %arg23[%c0_16, %c0_17, %c0_18], %26 {strides = array<i32>} : memref<4x8x1xf32, #tpu.memory_space<vmem>>, vector<4x8x1xf32>,
      %cst_19 = arith.constant 0.000000e+00 : f32
      %28 = vector.broadcast %cst_19 : f32 to vector<4x8x1xf32>
      %c0_20 = arith.constant 0 : index
      %c0_21 = arith.constant 0 : index
      %c0_22 = arith.constant 0 : index
      %29 = vector.load %arg24[%c0_20, %c0_21, %c0_22] : memref<4x8x1xf32, #tpu.memory_space<vmem>>, vector<4x8x1xf32>
      tpu.vector_store %arg24[%c0_20, %c0_21, %c0_22], %28 {strides = array<i32>} : memref<4x8x1xf32, #tpu.memory_space<vmem>>, vector<4x8x1xf32>,
      %cst_23 = arith.constant 0.000000e+00 : f32
      %30 = vector.broadcast %cst_23 : f32 to vector<4x8x8xf32>
      %c0_24 = arith.constant 0 : index
      %c0_25 = arith.constant 0 : index
      %c0_26 = arith.constant 0 : index
      %31 = vector.load %arg25[%c0_24, %c0_25, %c0_26] : memref<4x8x8xf32, #tpu.memory_space<vmem>>, vector<4x8x8xf32>
      tpu.vector_store %arg25[%c0_24, %c0_25, %c0_26], %30 {strides = array<i32>} : memref<4x8x8xf32, #tpu.memory_space<vmem>>, vector<4x8x8xf32>,
    } else {
    }
    %c8_i32 = arith.constant 8 : i32
    %3 = arith.muli %arg2, %c8_i32 : i32
    %c1_i32 = arith.constant 1 : i32
    %4 = arith.addi %arg1, %c1_i32 : i32
    %c8_i32_1 = arith.constant 8 : i32
    %5 = arith.muli %4, %c8_i32_1 : i32
    %6 = arith.cmpi slt, %3, %5 : i32
    %7 = arith.extui %6 : i1 to i32
    %c0_i32_2 = arith.constant 0 : i32
    %8 = arith.cmpi ne, %7, %c0_i32_2 : i32
    scf.if %8 {
      %c0 = arith.constant 0 : index
      %c0_5 = arith.constant 0 : index
      %c0_6 = arith.constant 0 : index
      %12 = vector.load %arg4[%c0, %c0_5, %c0_6] : memref<1x8x32xf32, #tpu.memory_space<vmem>>, vector<1x8x32xf32>
      %13 = vector.shape_cast %12 : vector<1x8x32xf32> to vector<8x32xf32>
      %14 = arith.truncf %13 : vector<8x32xf32> to vector<8x32xbf16>
      %c0_7 = arith.constant 0 : index
      %c0_8 = arith.constant 0 : index
      %15 = vector.load %arg7[%c0_7, %c0_8] : memref<32x32xbf16, #tpu.memory_space<vmem>>, vector<32x32xbf16>
      %cst = arith.constant dense<0.000000e+00> : vector<8x32xf32>
      %16 = tpu.matmul %14, %15, %cst {dimension_numbers = #tpu.dot_dimension_numbers<[1], [0], [0], [1], [0, 0, 1, 1], [], []>} : vector<8x32xbf16>, vector<32x32xbf16>, vector<8x32xf32> -> vector<8x32xf32>
      %c0_9 = arith.constant 0 : index
      %c0_10 = arith.constant 0 : index
      %17 = vector.load %arg8[%c0_9, %c0_10] : memref<1x32xf32, #tpu.memory_space<vmem>>, vector<1x32xf32>
      %18 = vector.broadcast %17 : vector<1x32xf32> to vector<8x32xf32>
      %19 = arith.addf %16, %18 : vector<8x32xf32>
      %c0_11 = arith.constant 0 : index
      %c0_12 = arith.constant 0 : index
      %20 = vector.load %arg9[%c0_11, %c0_12] : memref<32x32xbf16, #tpu.memory_space<vmem>>, vector<32x32xbf16>
      %cst_13 = arith.constant dense<0.000000e+00> : vector<8x32xf32>
      %21 = tpu.matmul %14, %20, %cst_13 {dimension_numbers = #tpu.dot_dimension_numbers<[1], [0], [0], [1], [0, 0, 1, 1], [], []>} : vector<8x32xbf16>, vector<32x32xbf16>, vector<8x32xf32> -> vector<8x32xf32>
      %c0_14 = arith.constant 0 : index
      %c0_15 = arith.constant 0 : index
      %22 = vector.load %arg10[%c0_14, %c0_15] : memref<1x32xf32, #tpu.memory_space<vmem>>, vector<1x32xf32>
      %23 = vector.broadcast %22 : vector<1x32xf32> to vector<8x32xf32>
      %24 = arith.addf %21, %23 : vector<8x32xf32>
      %25 = vector.shape_cast %19 : vector<8x32xf32> to vector<8x4x8xf32>
      %26 = tpu.transpose %25, [1, 0, 2] : vector<8x4x8xf32> -> vector<4x8x8xf32>
      %27 = arith.truncf %26 : vector<4x8x8xf32> to vector<4x8x8xbf16>
      %28 = vector.shape_cast %24 : vector<8x32xf32> to vector<8x4x8xf32>
      %29 = tpu.transpose %28, [1, 0, 2] : vector<8x4x8xf32> -> vector<4x8x8xf32>
      %30 = arith.truncf %29 : vector<4x8x8xf32> to vector<4x8x8xbf16>
      %c0_16 = arith.constant 0 : index
      %c0_17 = arith.constant 0 : index
      %c0_18 = arith.constant 0 : index
      %31 = vector.load %arg22[%c0_16, %c0_17, %c0_18] : memref<4x8x8xbf16, #tpu.memory_space<vmem>>, vector<4x8x8xbf16>
      "tpu.trace_start"() <{level = 10 : i32, message = "hqd,hkd->hqk"}> : () -> ()
      %cst_19 = arith.constant dense<0.000000e+00> : vector<4x8x8xf32>
      %32 = tpu.matmul %31, %27, %cst_19 {dimension_numbers = #tpu.dot_dimension_numbers<[2], [2], [1], [1], [0, 0, 0, 1, 1, 1], [0], [0]>} : vector<4x8x8xbf16>, vector<4x8x8xbf16>, vector<4x8x8xf32> -> vector<4x8x8xf32>
      "tpu.trace_stop"() : () -> ()
      %c8_i32_20 = arith.constant 8 : i32
      %33 = arith.muli %arg1, %c8_i32_20 : i32
      %34 = tpu.iota {dimensions = array<i32: 0>} : vector<8x8xi32>
      %35 = vector.broadcast %33 : i32 to vector<8x8xi32>
      %36 = arith.addi %35, %34 : vector<8x8xi32>
      %c8_i32_21 = arith.constant 8 : i32
      %37 = arith.muli %arg2, %c8_i32_21 : i32
      %38 = tpu.iota {dimensions = array<i32: 1>} : vector<8x8xi32>
      %39 = vector.broadcast %37 : i32 to vector<8x8xi32>
      %40 = arith.addi %39, %38 : vector<8x8xi32>
      %41 = arith.cmpi sgt, %40, %36 : vector<8x8xi32>
      %42 = vector.shape_cast %41 : vector<8x8xi1> to vector<1x8x8xi1>
      %cst_22 = arith.constant -1.000000e+30 : f32
      %43 = vector.shape_cast %42 : vector<1x8x8xi1> to vector<1x8x8xi1>
      %44 = vector.broadcast %43 : vector<1x8x8xi1> to vector<4x8x8xi1>
      %45 = vector.broadcast %cst_22 : f32 to vector<4x8x8xf32>
      %46 = arith.select %44, %45, %32 : vector<4x8x8xi1>, vector<4x8x8xf32>
      %c0_23 = arith.constant 0 : index
      %c0_24 = arith.constant 0 : index
      %c0_25 = arith.constant 0 : index
      %47 = vector.load %arg23[%c0_23, %c0_24, %c0_25] : memref<4x8x1xf32, #tpu.memory_space<vmem>>, vector<4x8x1xf32>
      %cst_26 = arith.constant dense<0xFF800000> : vector<4x8xf32>
      %48 = vector.multi_reduction <maximumf>, %46, %cst_26 [2] : vector<4x8x8xf32> to vector<4x8xf32>
      %49 = vector.shape_cast %48 : vector<4x8xf32> to vector<4x8x1xf32>
      %50 = arith.maximumf %47, %49 : vector<4x8x1xf32>
      %51 = arith.subf %47, %50 : vector<4x8x1xf32>
      %52 = math.exp %51 : vector<4x8x1xf32>
      %53 = vector.broadcast %50 : vector<4x8x1xf32> to vector<4x8x8xf32>
      %54 = arith.subf %46, %53 : vector<4x8x8xf32>
      %55 = math.exp %54 : vector<4x8x8xf32>
      %c0_27 = arith.constant 0 : index
      %c0_28 = arith.constant 0 : index
      %c0_29 = arith.constant 0 : index
      %56 = vector.load %arg24[%c0_27, %c0_28, %c0_29] : memref<4x8x1xf32, #tpu.memory_space<vmem>>, vector<4x8x1xf32>
      %57 = arith.mulf %52, %56 : vector<4x8x1xf32>
      %cst_30 = arith.constant dense<0.000000e+00> : vector<4x8xf32>
      %58 = vector.multi_reduction <add>, %55, %cst_30 [2] : vector<4x8x8xf32> to vector<4x8xf32>
      %59 = vector.shape_cast %58 : vector<4x8xf32> to vector<4x8x1xf32>
      %60 = arith.addf %57, %59 : vector<4x8x1xf32>
      %c0_31 = arith.constant 0 : index
      %c0_32 = arith.constant 0 : index
      %c0_33 = arith.constant 0 : index
      %61 = vector.load %arg24[%c0_31, %c0_32, %c0_33] : memref<4x8x1xf32, #tpu.memory_space<vmem>>, vector<4x8x1xf32>
      tpu.vector_store %arg24[%c0_31, %c0_32, %c0_33], %60 {strides = array<i32>} : memref<4x8x1xf32, #tpu.memory_space<vmem>>, vector<4x8x1xf32>,
      %c0_34 = arith.constant 0 : index
      %c0_35 = arith.constant 0 : index
      %c0_36 = arith.constant 0 : index
      %62 = vector.load %arg25[%c0_34, %c0_35, %c0_36] : memref<4x8x8xf32, #tpu.memory_space<vmem>>, vector<4x8x8xf32>
      %63 = vector.broadcast %52 : vector<4x8x1xf32> to vector<4x8x8xf32>
      %64 = arith.mulf %63, %62 : vector<4x8x8xf32>
      %65 = arith.truncf %55 : vector<4x8x8xf32> to vector<4x8x8xbf16>
      "tpu.trace_start"() <{level = 10 : i32, message = "hqk,hkd->hqd"}> : () -> ()
      %cst_37 = arith.constant dense<0.000000e+00> : vector<4x8x8xf32>
      %66 = tpu.matmul %65, %30, %cst_37 {dimension_numbers = #tpu.dot_dimension_numbers<[2], [1], [1], [2], [0, 0, 0, 1, 1, 2], [0], [0]>} : vector<4x8x8xbf16>, vector<4x8x8xbf16>, vector<4x8x8xf32> -> vector<4x8x8xf32>
      "tpu.trace_stop"() : () -> ()
      %67 = arith.addf %64, %66 : vector<4x8x8xf32>
      %c0_38 = arith.constant 0 : index
      %c0_39 = arith.constant 0 : index
      %c0_40 = arith.constant 0 : index
      %68 = vector.load %arg25[%c0_38, %c0_39, %c0_40] : memref<4x8x8xf32, #tpu.memory_space<vmem>>, vector<4x8x8xf32>
      tpu.vector_store %arg25[%c0_38, %c0_39, %c0_40], %67 {strides = array<i32>} : memref<4x8x8xf32, #tpu.memory_space<vmem>>, vector<4x8x8xf32>,
      %c0_41 = arith.constant 0 : index
      %c0_42 = arith.constant 0 : index
      %c0_43 = arith.constant 0 : index
      %69 = vector.load %arg23[%c0_41, %c0_42, %c0_43] : memref<4x8x1xf32, #tpu.memory_space<vmem>>, vector<4x8x1xf32>
      tpu.vector_store %arg23[%c0_41, %c0_42, %c0_43], %50 {strides = array<i32>} : memref<4x8x1xf32, #tpu.memory_space<vmem>>, vector<4x8x1xf32>,
    } else {
    }
    %c0_i32_3 = arith.constant 0 : i32
    %9 = arith.cmpi eq, %arg2, %c0_i32_3 : i32
    %10 = arith.extui %9 : i1 to i32
    %c0_i32_4 = arith.constant 0 : i32
    %11 = arith.cmpi ne, %10, %c0_i32_4 : i32
    scf.if %11 {
      %c0 = arith.constant 0 : index
      %c0_5 = arith.constant 0 : index
      %c0_6 = arith.constant 0 : index
      %12 = vector.load %arg25[%c0, %c0_5, %c0_6] : memref<4x8x8xf32, #tpu.memory_space<vmem>>, vector<4x8x8xf32>
      %c0_7 = arith.constant 0 : index
      %c0_8 = arith.constant 0 : index
      %c0_9 = arith.constant 0 : index
      %13 = vector.load %arg24[%c0_7, %c0_8, %c0_9] : memref<4x8x1xf32, #tpu.memory_space<vmem>>, vector<4x8x1xf32>
      %14 = tpu.reciprocal %13 {approx = true} : vector<4x8x1xf32> -> vector<4x8x1xf32>
      %15 = vector.broadcast %14 : vector<4x8x1xf32> to vector<4x8x8xf32>
      %16 = arith.mulf %12, %15 : vector<4x8x8xf32>
      %17 = tpu.transpose %16, [1, 0, 2] : vector<4x8x8xf32> -> vector<8x4x8xf32>
      %18 = vector.shape_cast %17 : vector<8x4x8xf32> to vector<8x32xf32>
      %c0_10 = arith.constant 0 : index
      %c0_11 = arith.constant 0 : index
      %c0_12 = arith.constant 0 : index
      %19 = vector.load %arg3[%c0_10, %c0_11, %c0_12] : memref<1x8x32xf32, #tpu.memory_space<vmem>>, vector<1x8x32xf32>
      %20 = vector.shape_cast %19 : vector<1x8x32xf32> to vector<8x32xf32>
      %21 = arith.truncf %18 : vector<8x32xf32> to vector<8x32xbf16>
      %c0_13 = arith.constant 0 : index
      %c0_14 = arith.constant 0 : index
      %22 = vector.load %arg11[%c0_13, %c0_14] : memref<32x32xbf16, #tpu.memory_space<vmem>>, vector<32x32xbf16>
      %cst = arith.constant dense<0.000000e+00> : vector<8x32xf32>
      %23 = tpu.matmul %21, %22, %cst {dimension_numbers = #tpu.dot_dimension_numbers<[1], [0], [0], [1], [0, 0, 1, 1], [], []>} : vector<8x32xbf16>, vector<32x32xbf16>, vector<8x32xf32> -> vector<8x32xf32>
      %c0_15 = arith.constant 0 : index
      %c0_16 = arith.constant 0 : index
      %24 = vector.load %arg12[%c0_15, %c0_16] : memref<1x32xf32, #tpu.memory_space<vmem>>, vector<1x32xf32>
      %25 = vector.broadcast %24 : vector<1x32xf32> to vector<8x32xf32>
      %26 = arith.addf %23, %25 : vector<8x32xf32>
      %27 = arith.addf %26, %20 : vector<8x32xf32>
      %c0_17 = arith.constant 0 : index
      %c0_18 = arith.constant 0 : index
      %28 = vector.load %arg17[%c0_17, %c0_18] : memref<1x32xf32, #tpu.memory_space<vmem>>, vector<1x32xf32>
      %c0_19 = arith.constant 0 : index
      %c0_20 = arith.constant 0 : index
      %29 = vector.load %arg18[%c0_19, %c0_20] : memref<1x32xf32, #tpu.memory_space<vmem>>, vector<1x32xf32>
      %cst_21 = arith.constant dense<0.000000e+00> : vector<8xf32>
      %30 = vector.multi_reduction <add>, %27, %cst_21 [1] : vector<8x32xf32> to vector<8xf32>
      %31 = vector.shape_cast %30 : vector<8xf32> to vector<8x1xf32>
      %cst_22 = arith.constant 3.200000e+01 : f32
      %32 = vector.broadcast %cst_22 : f32 to vector<8x1xf32>
      %33 = arith.divf %31, %32 : vector<8x1xf32>
      %34 = vector.broadcast %33 : vector<8x1xf32> to vector<8x32xf32>
      %35 = arith.subf %27, %34 : vector<8x32xf32>
      %36 = arith.mulf %35, %35 : vector<8x32xf32>
      %cst_23 = arith.constant dense<0.000000e+00> : vector<8xf32>
      %37 = vector.multi_reduction <add>, %36, %cst_23 [1] : vector<8x32xf32> to vector<8xf32>
      %38 = vector.shape_cast %37 : vector<8xf32> to vector<8x1xf32>
      %cst_24 = arith.constant 3.200000e+01 : f32
      %39 = vector.broadcast %cst_24 : f32 to vector<8x1xf32>
      %40 = arith.divf %38, %39 : vector<8x1xf32>
      %41 = vector.broadcast %33 : vector<8x1xf32> to vector<8x32xf32>
      %42 = arith.subf %27, %41 : vector<8x32xf32>
      %cst_25 = arith.constant 9.99999974E-6 : f32
      %43 = vector.broadcast %cst_25 : f32 to vector<8x1xf32>
      %44 = arith.addf %40, %43 : vector<8x1xf32>
      %45 = math.rsqrt %44 : vector<8x1xf32>
      %46 = vector.broadcast %45 : vector<8x1xf32> to vector<8x32xf32>
      %47 = arith.mulf %42, %46 : vector<8x32xf32>
      %48 = vector.broadcast %28 : vector<1x32xf32> to vector<8x32xf32>
      %49 = arith.mulf %47, %48 : vector<8x32xf32>
      %50 = vector.broadcast %29 : vector<1x32xf32> to vector<8x32xf32>
      %51 = arith.addf %49, %50 : vector<8x32xf32>
      %52 = arith.truncf %51 : vector<8x32xf32> to vector<8x32xbf16>
      %c0_26 = arith.constant 0 : index
      %c0_27 = arith.constant 0 : index
      %53 = vector.load %arg13[%c0_26, %c0_27] : memref<32x64xbf16, #tpu.memory_space<vmem>>, vector<32x64xbf16>
      %cst_28 = arith.constant dense<0.000000e+00> : vector<8x64xf32>
      %54 = tpu.matmul %52, %53, %cst_28 {dimension_numbers = #tpu.dot_dimension_numbers<[1], [0], [0], [1], [0, 0, 1, 1], [], []>} : vector<8x32xbf16>, vector<32x64xbf16>, vector<8x64xf32> -> vector<8x64xf32>
      %c0_29 = arith.constant 0 : index
      %c0_30 = arith.constant 0 : index
      %55 = vector.load %arg14[%c0_29, %c0_30] : memref<1x64xf32, #tpu.memory_space<vmem>>, vector<1x64xf32>
      %56 = vector.broadcast %55 : vector<1x64xf32> to vector<8x64xf32>
      %57 = arith.addf %54, %56 : vector<8x64xf32>
      %cst_31 = arith.constant 0.000000e+00 : f32
      %58 = vector.broadcast %cst_31 : f32 to vector<8x64xf32>
      %59 = arith.maximumf %57, %58 : vector<8x64xf32>
      %60 = arith.truncf %59 : vector<8x64xf32> to vector<8x64xbf16>
      %c0_32 = arith.constant 0 : index
      %c0_33 = arith.constant 0 : index
      %61 = vector.load %arg15[%c0_32, %c0_33] : memref<64x32xbf16, #tpu.memory_space<vmem>>, vector<64x32xbf16>
      %cst_34 = arith.constant dense<0.000000e+00> : vector<8x32xf32>
      %62 = tpu.matmul %60, %61, %cst_34 {dimension_numbers = #tpu.dot_dimension_numbers<[1], [0], [0], [1], [0, 0, 1, 1], [], []>} : vector<8x64xbf16>, vector<64x32xbf16>, vector<8x32xf32> -> vector<8x32xf32>
      %c0_35 = arith.constant 0 : index
      %c0_36 = arith.constant 0 : index
      %63 = vector.load %arg16[%c0_35, %c0_36] : memref<1x32xf32, #tpu.memory_space<vmem>>, vector<1x32xf32>
      %64 = vector.broadcast %63 : vector<1x32xf32> to vector<8x32xf32>
      %65 = arith.addf %62, %64 : vector<8x32xf32>
      %66 = arith.addf %65, %51 : vector<8x32xf32>
      %c0_37 = arith.constant 0 : index
      %c0_38 = arith.constant 0 : index
      %67 = vector.load %arg19[%c0_37, %c0_38] : memref<1x32xf32, #tpu.memory_space<vmem>>, vector<1x32xf32>
      %c0_39 = arith.constant 0 : index
      %c0_40 = arith.constant 0 : index
      %68 = vector.load %arg20[%c0_39, %c0_40] : memref<1x32xf32, #tpu.memory_space<vmem>>, vector<1x32xf32>
      %cst_41 = arith.constant dense<0.000000e+00> : vector<8xf32>
      %69 = vector.multi_reduction <add>, %66, %cst_41 [1] : vector<8x32xf32> to vector<8xf32>
      %70 = vector.shape_cast %69 : vector<8xf32> to vector<8x1xf32>
      %cst_42 = arith.constant 3.200000e+01 : f32
      %71 = vector.broadcast %cst_42 : f32 to vector<8x1xf32>
      %72 = arith.divf %70, %71 : vector<8x1xf32>
      %73 = vector.broadcast %72 : vector<8x1xf32> to vector<8x32xf32>
      %74 = arith.subf %66, %73 : vector<8x32xf32>
      %75 = arith.mulf %74, %74 : vector<8x32xf32>
      %cst_43 = arith.constant dense<0.000000e+00> : vector<8xf32>
      %76 = vector.multi_reduction <add>, %75, %cst_43 [1] : vector<8x32xf32> to vector<8xf32>
      %77 = vector.shape_cast %76 : vector<8xf32> to vector<8x1xf32>
      %cst_44 = arith.constant 3.200000e+01 : f32
      %78 = vector.broadcast %cst_44 : f32 to vector<8x1xf32>
      %79 = arith.divf %77, %78 : vector<8x1xf32>
      %80 = vector.broadcast %72 : vector<8x1xf32> to vector<8x32xf32>
      %81 = arith.subf %66, %80 : vector<8x32xf32>
      %cst_45 = arith.constant 9.99999974E-6 : f32
      %82 = vector.broadcast %cst_45 : f32 to vector<8x1xf32>
      %83 = arith.addf %79, %82 : vector<8x1xf32>
      %84 = math.rsqrt %83 : vector<8x1xf32>
      %85 = vector.broadcast %84 : vector<8x1xf32> to vector<8x32xf32>
      %86 = arith.mulf %81, %85 : vector<8x32xf32>
      %87 = vector.broadcast %67 : vector<1x32xf32> to vector<8x32xf32>
      %88 = arith.mulf %86, %87 : vector<8x32xf32>
      %89 = vector.broadcast %68 : vector<1x32xf32> to vector<8x32xf32>
      %90 = arith.addf %88, %89 : vector<8x32xf32>
      %c0_46 = arith.constant 0 : index
      %c0_47 = arith.constant 0 : index
      %c0_48 = arith.constant 0 : index
      %91 = vector.load %arg21[%c0_46, %c0_47, %c0_48] : memref<1x8x32xf32, #tpu.memory_space<vmem>>, vector<1x8x32xf32>
      %92 = vector.shape_cast %91 : vector<1x8x32xf32> to vector<8x32xf32>
      %93 = vector.shape_cast %90 : vector<8x32xf32> to vector<1x8x32xf32>
      tpu.vector_store %arg21[%c0_46, %c0_47, %c0_48], %93 {strides = array<i32>} : memref<1x8x32xf32, #tpu.memory_space<vmem>>, vector<1x8x32xf32>,
    } else {
    }
    return
  }
  func.func @transform_0(%arg0: i32, %arg1: i32, %arg2: i32) -> (i32, i32, i32) {
    %c0_i32 = arith.constant 0 : i32
    %c0_i32_0 = arith.constant 0 : i32
    return %arg0, %arg1, %c0_i32 : i32, i32, i32
  }
  func.func @transform_1(%arg0: i32, %arg1: i32, %arg2: i32) -> (i32, i32, i32) {
    %c0_i32 = arith.constant 0 : i32
    %c0_i32_0 = arith.constant 0 : i32
    return %arg0, %arg2, %c0_i32 : i32, i32, i32
  }
  func.func @transform_2(%arg0: i32, %arg1: i32, %arg2: i32) -> (i32, i32) {
    %c0_i32 = arith.constant 0 : i32
    %c0_i32_0 = arith.constant 0 : i32
    %c0_i32_1 = arith.constant 0 : i32
    return %c0_i32, %c0_i32_0 : i32, i32
  }
  func.func @transform_3(%arg0: i32, %arg1: i32, %arg2: i32) -> (i32, i32) {
    %c0_i32 = arith.constant 0 : i32
    %c0_i32_0 = arith.constant 0 : i32
    %c0_i32_1 = arith.constant 0 : i32
    return %c0_i32, %c0_i32_0 : i32, i32
  }
  func.func @transform_4(%arg0: i32, %arg1: i32, %arg2: i32) -> (i32, i32) {
    %c0_i32 = arith.constant 0 : i32
    %c0_i32_0 = arith.constant 0 : i32
    %c0_i32_1 = arith.constant 0 : i32
    return %c0_i32, %c0_i32_0 : i32, i32
  }
  func.func @transform_5(%arg0: i32, %arg1: i32, %arg2: i32) -> (i32, i32) {
    %c0_i32 = arith.constant 0 : i32
    %c0_i32_0 = arith.constant 0 : i32
    %c0_i32_1 = arith.constant 0 : i32
    return %c0_i32, %c0_i32_0 : i32, i32
  }
  func.func @transform_6(%arg0: i32, %arg1: i32, %arg2: i32) -> (i32, i32) {
    %c0_i32 = arith.constant 0 : i32
    %c0_i32_0 = arith.constant 0 : i32
    %c0_i32_1 = arith.constant 0 : i32
    return %c0_i32, %c0_i32_0 : i32, i32
  }
  func.func @transform_7(%arg0: i32, %arg1: i32, %arg2: i32) -> (i32, i32) {
    %c0_i32 = arith.constant 0 : i32
    %c0_i32_0 = arith.constant 0 : i32
    %c0_i32_1 = arith.constant 0 : i32
    return %c0_i32, %c0_i32_0 : i32, i32
  }
  func.func @transform_8(%arg0: i32, %arg1: i32, %arg2: i32) -> (i32, i32) {
    %c0_i32 = arith.constant 0 : i32
    %c0_i32_0 = arith.constant 0 : i32
    %c0_i32_1 = arith.constant 0 : i32
    return %c0_i32, %c0_i32_0 : i32, i32
  }
  func.func @transform_9(%arg0: i32, %arg1: i32, %arg2: i32) -> (i32, i32) {
    %c0_i32 = arith.constant 0 : i32
    %c0_i32_0 = arith.constant 0 : i32
    %c0_i32_1 = arith.constant 0 : i32
    return %c0_i32, %c0_i32_0 : i32, i32
  }
  func.func @transform_10(%arg0: i32, %arg1: i32, %arg2: i32) -> (i32, i32) {
    %c0_i32 = arith.constant 0 : i32
    %c0_i32_0 = arith.constant 0 : i32
    %c0_i32_1 = arith.constant 0 : i32
    return %c0_i32, %c0_i32_0 : i32, i32
  }
  func.func @transform_11(%arg0: i32, %arg1: i32, %arg2: i32) -> (i32, i32) {
    %c0_i32 = arith.constant 0 : i32
    %c0_i32_0 = arith.constant 0 : i32
    %c0_i32_1 = arith.constant 0 : i32
    return %c0_i32, %c0_i32_0 : i32, i32
  }
  func.func @transform_12(%arg0: i32, %arg1: i32, %arg2: i32) -> (i32, i32) {
    %c0_i32 = arith.constant 0 : i32
    %c0_i32_0 = arith.constant 0 : i32
    %c0_i32_1 = arith.constant 0 : i32
    return %c0_i32, %c0_i32_0 : i32, i32
  }
  func.func @transform_13(%arg0: i32, %arg1: i32, %arg2: i32) -> (i32, i32) {
    %c0_i32 = arith.constant 0 : i32
    %c0_i32_0 = arith.constant 0 : i32
    %c0_i32_1 = arith.constant 0 : i32
    return %c0_i32, %c0_i32_0 : i32, i32
  }
  func.func @transform_14(%arg0: i32, %arg1: i32, %arg2: i32) -> (i32, i32) {
    %c0_i32 = arith.constant 0 : i32
    %c0_i32_0 = arith.constant 0 : i32
    %c0_i32_1 = arith.constant 0 : i32
    return %c0_i32, %c0_i32_0 : i32, i32
  }
  func.func @transform_15(%arg0: i32, %arg1: i32, %arg2: i32) -> (i32, i32) {
    %c0_i32 = arith.constant 0 : i32
    %c0_i32_0 = arith.constant 0 : i32
    %c0_i32_1 = arith.constant 0 : i32
    return %c0_i32, %c0_i32_0 : i32, i32
  }
  func.func @transform_16(%arg0: i32, %arg1: i32, %arg2: i32) -> (i32, i32) {
    %c0_i32 = arith.constant 0 : i32
    %c0_i32_0 = arith.constant 0 : i32
    %c0_i32_1 = arith.constant 0 : i32
    return %c0_i32, %c0_i32_0 : i32, i32
  }
  func.func @transform_17(%arg0: i32, %arg1: i32, %arg2: i32) -> (i32, i32) {
    %c0_i32 = arith.constant 0 : i32
    %c0_i32_0 = arith.constant 0 : i32
    %c0_i32_1 = arith.constant 0 : i32
    return %c0_i32, %c0_i32_0 : i32, i32
  }
  func.func @transform_18(%arg0: i32, %arg1: i32, %arg2: i32) -> (i32, i32, i32) {
    %c0_i32 = arith.constant 0 : i32
    %c0_i32_0 = arith.constant 0 : i32
    return %arg0, %arg1, %c0_i32 : i32, i32, i32
  }
}

</mosaic_0001>

<bundles_post_ra>
// kernel: tpu_custom_call.1
= control target key start
LH: loop header
LB: loop body
LE: loop exit
PB: predicated region body
PF: predicated region fallthrough
CT: control target
= control target key end

     0   :  { %s3147_s0 = inlined_call_operand.vmem [shape: f32[2,8,32], index: 0, kind: input, shape index: {}]   ;;  %s3148_s1 = inlined_call_operand.vmem [shape: f32[2,8,32], index: 1, kind: input, shape index: {}]   ;;  %s3149_s2 = inlined_call_operand.vmem [shape: bf16[32,32], index: 2, kind: input, shape index: {}]   ;;  %s3150_s3 = inlined_call_operand.vmem [shape: f32[1,32], index: 3, kind: input, shape index: {}]   ;;  %s3151_s4 = inlined_call_operand.hbm [shape: bf16[32,32], index: 4, kind: input, shape index: {}]   ;;  %s3152_s5 = inlined_call_operand.vmem [shape: f32[1,32], index: 5, kind: input, shape index: {}]   ;;  %s3153_s6 = inlined_call_operand.hbm [shape: bf16[32,32], index: 6, kind: input, shape index: {}]   ;;  %s3154_s7 = inlined_call_operand.vmem [shape: f32[1,32], index: 7, kind: input, shape index: {}]   ;;  %s3155_s8 = inlined_call_operand.hbm [shape: bf16[32,32], index: 8, kind: input, shape index: {}]   ;;  %s3156_s9 = inlined_call_operand.vmem [shape: f32[1,32], index: 9, kind: input, shape index: {}]   ;;  %s3157_s10 = inlined_call_operand.hbm [shape: bf16[32,64], index: 10, kind: input, shape index: {}]   ;;  %s3158_s11 = inlined_call_operand.vmem [shape: f32[1,64], index: 11, kind: input, shape index: {}]   ;;  %s3159_s12 = inlined_call_operand.vmem [shape: bf16[64,32], index: 12, kind: input, shape index: {}]   ;;  %s3160_s13 = inlined_call_operand.vmem [shape: f32[1,32], index: 13, kind: input, shape index: {}]   ;;  %s3161_s14 = inlined_call_operand.vmem [shape: f32[1,32], index: 14, kind: input, shape index: {}]   ;;  %s3162_s15 = inlined_call_operand.vmem [shape: f32[1,32], index: 15, kind: input, shape index: {}]   ;;  %s3163_s16 = inlined_call_operand.vmem [shape: f32[1,32], index: 16, kind: input, shape index: {}]   ;;  %s3164_s17 = inlined_call_operand.vmem [shape: f32[1,32], index: 17, kind: input, shape index: {}]   ;;  %s3165_s18 = inlined_call_operand.hbm [shape: f32[2,8,32], index: 18, kind: output, shape index: {}]  }
   0x1   :  { %3178 = sst [smem:[#allocation28_spill]] %s3147_s0 }
   0x2   :  { %3179 = sst [smem:[#allocation29_spill]] %s3148_s1 }
   0x3   :  { %3180 = sst [smem:[#allocation30_spill]] %s3149_s2 }
   0x4   :  { %3181 = sst [smem:[#allocation31_spill]] %s3153_s6 }
   0x5   :  { %3182 = sst [smem:[#allocation32_spill]] %s3163_s16 }
   0x6   :  { %3183 = sst [smem:[#allocation33_spill]] %s3164_s17 }
   0x7   :  { %3184 = sst [smem:[#allocation34_spill]] %s3165_s18 }
   0x8   :  { %23 = vsyncpa [#allocation7], 0 }
   0x9   :  { %24 = vsyncpa [#allocation10], 0 }
   0xa   :  { %25 = vsyncpa [#allocation13], 0 }
   0xb   :  { %26 = vsyncpa [#allocation8], 0 }
   0xc   :  { %28 = vsyncpa [#allocation8 + $0x1], 0  ;;  %s2643_s27 = smov 0   ;;  %s2645_s28 = smov 0  }
   0xd   :  { %s2647_s29 = smov 0   ;;  %s2649_s30 = smov 0  }
   0xe   :  { %s2651_s0 = smov 0   ;;  %s2653_s19 = smov 0  }
   0xf LB: > { %3185 = sst [smem:[#allocation19_spill]] %s2508_s27  ;;  %s2046_s1 = sadd.s32 4294967295, %s2528_s19   ;;  %s2528_s19 = sphi %s2653_s19, %s34_s19   ;;  %s2524_s0 = sphi %s2651_s0, %s3216_s0   ;;  %s2520_s30 = sphi %s2649_s30, %s3215_s30   ;;  %s2516_s29 = sphi %s2647_s29, %s3214_s29   ;;  %s2512_s28 = sphi %s2645_s28, %s3213_s28   ;;  %s2508_s27 = sphi %s2643_s27, %s3212_s27  }
  0x10   : > { %3186 = sst [smem:[#allocation20_spill]] %s2512_s28  ;;  %s2047_s20 = sadd.s32 4294967294, %s2528_s19  }
  0x11   : > { %3187 = sst [smem:[#allocation21_spill]] %s2516_s29  ;;  %s53_s21 = sadd.s32 1, %s2524_s0 }
  0x12   : > { %3188 = sst [smem:[#allocation22_spill]] %s2524_s0  ;;  %s454_s22 = sadd.s32 1, %s2516_s29 }
  0x13   : > { %3189 = sst [smem:[#allocation23_spill]] %s2528_s19  ;;  %p55_p0 = scmp.ge.s32.totalorder %s53_s21, 2 }
  0x14   : > { %p464_p1 = scmp.ne.s32.totalorder %s2516_s29, %s2512_s28  ;;  %p465_p2 = scmp.eq.s32.totalorder %s2046_s1, 1 }
  0x15   : > { %p470_p3 = scmp.ne.s32.totalorder %s2512_s28, %s2508_s27  ;;  %s3218_s21 = smov (%p55_p0, %s53_s21), 0 }
  0x16   : > { %3190 = sst [smem:[#allocation24_spill]] %s3218_s21  ;;  %p2683_p4 = por %p465_p2, %p464_p1 }
  0x17   : > { %p471_p5 = scmp.eq.s32.totalorder %s2047_s20, 1  ;;  %s449_s23 = ssub.s32 %s2524_s0, %s3218_s21 }
  0x18   : > { %s3191_s2 = scalar_select %p2683_p4, 1, 0 }
  0x19   : > { %p2048_p6 = scmp.ge.s32.totalorder %s2528_s19, 1  ;;  %p452_p7 = scmp.eq.s32.totalorder %s449_s23, 0 }
  0x1a   : > { %3192 = sst [smem:[#allocation25_spill]] %s3191_s2  ;;  %p2690_p8 = por %p471_p5, %p470_p3 }
  0x1b   : > { %p478_p9 = scmp.lt.s32.totalorder %s2528_s19, 3  ;;  %p2702_p11 = scmp.eq.s32.totalorder %s2046_s1, 0 }
  0x1c   : > { %s3193_s24 = scalar_select %p2690_p8, 1, 0 }
  0x1d   : > { %s2696_s25 = scalar_select %p452_p7, %s2516_s29, %s454_s22  }
  0x1e   : > { %3194 = sst [smem:[#allocation26_spill]] %s3193_s24  ;;  %p2698_p10 = pnand %p2048_p6, %p478_p9 }
  0x1f   : > { %3195 = sst [smem:[#allocation27_spill]] %s2696_s25  ;;  %s2530_s0 = smov [#allocation9]  }
  0x20   : > { %p2168_p12 = pneg %p2698_p10  ;;  %s3198_s6 = sld [smem:[#allocation31_spill]] }
  0x21   : > { %s514_s1 = sshll.u32 %s2530_s0, 4  ;;  %s2531_s25 = smov 64   ;;  %s515_s1 = int_to_ptr.vmem [resolvable:$true] %s514_s1 }
  0x22   : > { %p2713_p13 = pnand %p2702_p11, %p2168_p12  ;;  %s2532_s29 = smov 4  }
  0x23   : > { %s495_s20 = sshll.u32 %s3151_s4, 4  ;;  %s2533_s23 = smov [#allocation6]   ;;  %s496_s20 = int_to_ptr.hbm [resolvable:$true] %s495_s20 }
  0x24   : > { %s529_s18 = sshll.u32 %s3155_s8, 4  ;;  %s2534_s0 = smov [#allocation11]   ;;  %s530_s18 = int_to_ptr.hbm [resolvable:$true] %s529_s18 }
  0x25   : > { %s531_s16 = sshll.u32 %s2534_s0, 4  ;;  %s2535_s19 = smov [#allocation12]   ;;  %s532_s16 = int_to_ptr.vmem [resolvable:$true] %s531_s16 }
  0x26   : > { %s512_s21 = sshll.u32 %s3198_s6, 4  ;;  %s497_s6 = sshll.u32 %s2533_s23, 4  ;;  %s513_s21 = int_to_ptr.hbm [resolvable:$true] %s512_s21  ;;  %s498_s6 = int_to_ptr.vmem [resolvable:$true] %s497_s6 }
  0x27   : > { %2174 = dma.hbm_to_vmem [thread:$0]  (!%p2713_p13), %s513_s21, 256, %s515_s1, [#allocation10], %s2531_s25, %s2531_s25, %s2532_s29  }
  0x28   : > { %2171 = dma.hbm_to_vmem [thread:$0]  (!%p2713_p13), %s496_s20, 256, %s498_s6, [#allocation7], %s2531_s25, %s2531_s25, %s2532_s29  }
  0x29   : > { %s546_s1 = sshll.u32 %s3157_s10, 4  ;;  %s548_s24 = sshll.u32 %s2535_s19, 4  ;;  %s547_s1 = int_to_ptr.hbm [resolvable:$true] %s546_s1  ;;  %s549_s24 = int_to_ptr.vmem [resolvable:$true] %s548_s24 }
  0x2a   : > { %2177 = dma.hbm_to_vmem [thread:$0]  (!%p2713_p13), %s530_s18, 256, %s532_s16, [#allocation10], %s2531_s25, %s2531_s25, %s2532_s29  }
  0x2b   : > { %2180 = dma.hbm_to_vmem [thread:$0]  (!%p2713_p13), %s547_s1, 256, %s549_s24, [#allocation13], %s2531_s25, %s2531_s25, %s2532_s29  }
  0x2c   : > { %605 = sbr.rel (%p2698_p10) target bundleno = 2089 (0x829), region = 92 }
  0x31   : > { %2491 = dma.done.wait (%p2702_p11), [#allocation7], 256  }
  0x32   : > { %2493 = vsyncadd (%p2702_p11), [#allocation7], 4294967040 }
  0x33   : > { %2495 = dma.done.wait (%p2702_p11), [#allocation10], 512  }
  0x34   : > { %2497 = vsyncadd (%p2702_p11), [#allocation10], 4294966784 }
  0x35   : > { %2499 = dma.done.wait (%p2702_p11), [#allocation13], 256  }
  0x36   : > { %2501 = vsyncadd (%p2702_p11), [#allocation13], 4294967040  ;;  %p684_p0 = scmp.lt.s32.totalorder %s2520_s30, 1  ;;  %s3200_s28 = sld [smem:[#allocation28_spill]]  ;;  %v2139_v1 = vld [vmem:[#allocation6 + $0x8] sm:$0xff]  ;;  %v2138_v3 = vld [vmem:[#allocation6] sm:$0xff] }
  0x37   : > { %s3201_s26 = sld [smem:[#allocation29_spill]]  ;;  %926 = vmatpush.bf16.msra.mxu1 %v2139_v1  ;;  %vm725_vm0 = vcmask 261120   ;;  %v2141_v8 = vld [vmem:[#allocation9 + $0x8] sm:$0xff]  ;;  %v2140_v9 = vld [vmem:[#allocation9] sm:$0xff]  ;;  %s2536_s17 = smov 104   ;;  %vm754_vm1 = vcmask 1047556  }
  0x38   : > { %s685_s6 = scalar_select %p684_p0, %s2520_s30, 1  ;;  %959 = vmatpush.bf16.msra.mxu2 %v2141_v8  ;;  %v2278_v10 = vld [vmem:[%s3150_s3] ss:$0 sm:$0xff]  ;;  %v2539_v23 = vmov 1983009808   ;;  %vm868_vm2 = vcmask 60416  }
  0x39   : > { %s3202_s0 = sld [smem:[#allocation30_spill]]  ;;  %v2279_v11 = vld [vmem:[%s3152_s5] ss:$0 sm:$0xff]  ;;  %s2537_s18 = smov 120   ;;  %v759_v24 = vunpack.c.l.s4 %v2539_v23  ;;  %v2540_v40 = vmov 1934713408  }
  0x3a   : > { %s2060_s16 = sshll.u32 %s685_s6, 3  ;;  %v2280_v20 = vld [vmem:[%s3154_s7] ss:$0 sm:$0xff]  ;;  %v783_v41 = vunpack.c.l.s4 %v2540_v40  ;;  %vm882_vm3 = vcmask 64512   ;;  %vm873_vm5 = vcmask 7168   ;;  %vm1440_vm6 = vcmask 1043456  }
  0x3b   : > { %927 = vmatpush.bf16.msra.mxu1 %v2138_v3  ;;  %v2782_v35 = vunpack.c.0.s8 %v759_v24  ;;  %s2546_s20 = smov 8   ;;  %vm1690_vm7 = vcmask 130048   ;;  %vm1692_vm8 = vcmask 195584   ;;  %vm1848_vm13 = vcmask 523264   ;;  %s2133_s1 = sshll.u32 %s2520_s30, 3 }
  0x3c   : > { %s2753_s29 = scalar_lea.vmem %s3200_s28, %s2060_s16  ;;  %960 = vmatpush.bf16.msra.mxu2 %v2140_v9  ;;  %s2538_s28 = smov 112   ;;  %v2792_v52 = vunpack.c.0.s8 %v783_v41 }
  0x3d   : > { %s697_s22 = scalar_lea.vmem %s3201_s26, %s2060_s16  ;;  %v703_v4 = vld [vmem:[%s2753_s29] sm:$0xff]  ;;  %s2544_s26 = smov 24  }
  0x3e   : > { %v894_v5 = vld [vmem:[%s697_s22] sm:$0xff]  ;;  %v704_v6 = vpack.c.bf16 %v703_v4, %v703_v4  ;;  %s2545_s22 = smov 16   ;;  %s3205_s6 = sld [smem:[#allocation32_spill]] }
  0x3f   : > { %s3203_s21 = smov %s3202_s0  ;;  %v2137_v0 = vld [vmem:[%s3202_s0 + $0x8] sm:$0xff]  ;;  %v895_v7 = vpack.c.bf16 %v894_v5, %v894_v5  ;;  %s3204_s0 = sld [smem:[#allocation20_spill]] }
  0x40   : > { %v2136_v2 = vld [vmem:[%s3203_s21] sm:$0xff]  ;;  %735 = vmatpush.bf16.msra.mxu0 %v2137_v0 }
  0x41   : > { %2079 = vmatmul.msk.bf16.vlgmr.msra.gmra.mxu1 %vm725_vm0, %v895_v7  ;;  %2088 = vmatmul.msk.bf16.vlgmr.msra.gmra.mxu2 %vm725_vm0, %v895_v7 }
  0x44   : > { %736 = vmatpush.bf16.msra.mxu0 %v2136_v2 }
  0x47   : > { %2070 = vmatmul.msk.bf16.vlgmr.msra.gmra.mxu0 %vm725_vm0, %v704_v6 }
  0xbe   : > { %v929_v13 = vpop.f32.mrf.mxu1 }
  0xbf   : > { %v930_v15 = vadd.f32 %v2279_v11, %v929_v13 }
  0xc1   : > { %v979_v45 = vrot.slane %v930_v15, 4 }
  0xc4   : > { %v738_v12 = vpop.f32.mrf.mxu0  ;;  %v962_v21 = vpop.f32.mrf.mxu2 }
  0xc5   : > { %v739_v14 = vadd.f32 %v2278_v10, %v738_v12  ;;  %v2779_v26 = vadd.f32 %v2280_v20, %v962_v21 }
  0xc6   : > { %v931_v19 = vpop.f32.mrf.mxu1 }
  0xc7   : > { %v742_v16 = vmul.f32 0.35355338, %v739_v14  ;;  %1092 = vrot.lane.b32.xlu2 %v2779_v26, %s2537_s18 }
  0xc9   : > { %v2270_v17 = vpack.i.bf16 %v930_v15, %v742_v16  ;;  %v756_v47 = vrot.slane %v742_v16, 4 }
  0xcb   : > { %2271 = vrot.lane.b32.xlu1 %v2270_v17, %s2536_s17  ;;  %2261 = vrot.lane.b32.xlu0 %v2270_v17, %s2537_s18  ;;  %s3206_s18 = sld [smem:[#allocation34_spill]] }
  0xcc   : > { %v740_v18 = vpop.f32.mrf.mxu0  ;;  %v964_v42 = vpop.f32.mrf.mxu2 }
  0xcf   : > { %1095 = vrot.lane.b32.xlu2 %v2779_v26, %s2538_s28 }
  0xd3   : > { %2266 = vrot.lane.b32.xlu0 %v2270_v17, %s2538_s28  ;;  %s1911_s28 = scalar_lea.hbm %s3206_s18, %s2133_s1 }
  0xd4   : > { %s1915_s23 = sshll.u32 %s1911_s28, 4  ;;  %s1916_s23 = int_to_ptr.hbm [resolvable:$true] %s1915_s23 }
  0xd5   : > { %s2452_s19 = sshra.s32 %s1916_s23, 4  ;;  %s2453_s19 = int_to_ptr.hbm [resolvable:$true] %s2452_s19 }
  0xd6   : > { %s2454_s1 = scalar_lea.hbm %s2453_s19, 8  ;;  %p2459_p5 = scmp.lt.s32.totalorder %s2453_s19, %s3206_s18 }
  0xd7   : > { %p2455_p1 = scmp.ne.s32.totalorder %s2453_s19, %s2454_s1 }
  0xd9   : > { %p2456_p2 = pnand %p2455_p1, %p2683_p4 }
  0xdb   : > { %p2457_p3 = pneg %p2456_p2 }
 0x13d   : > { %v2272_v22 = vpop.permute.xlu1 %2271  ;;  %v2262_v25 = vpop.permute.xlu0 %2261 }
 0x13e   : > { %v2274_v27 = vunpack.i.h.bf16 %v2272_v22  ;;  %v2273_v28 = vunpack.i.l.bf16 %v2272_v22  ;;  %v2264_v29 = vunpack.i.h.bf16 %v2262_v25  ;;  %v2263_v30 = vunpack.i.l.bf16 %v2262_v25 }
 0x140   : > { %v989_v31 = vrot.slane %v2274_v27, 4  ;;  %v766_v32 = vrot.slane %v2273_v28, 4  ;;  %v991_v33 = vrot.slane %v2264_v29, 4  ;;  %v768_v34 = vrot.slane %v2263_v30, 4 }
 0x142   : > { %v990_v36 = vsel %vm754_vm1, %v989_v31, %v2264_v29  ;;  %v769_v37 = vsel %vm754_vm1, %v2273_v28, %v768_v34  ;;  %v992_v38 = vsel %vm754_vm1, %v2274_v27, %v991_v33  ;;  %v767_v39 = vsel %vm754_vm1, %v766_v32, %v2263_v30 }
 0x143   : > { %v996_v43 = vperm.slane %v990_v36, %v2782_v35  ;;  %v777_v44 = vperm.slane %v769_v37, %v2782_v35  ;;  %v1000_v48 = vperm.slane %v992_v38, %v2782_v35  ;;  %v773_v49 = vperm.slane %v767_v39, %v2782_v35 }
 0x145   : > { %v2267_v46 = vpop.permute.xlu0 %2266  ;;  %v1001_v57 = vrot.slane %v996_v43, 4  ;;  %v790_v58 = vrot.slane %v777_v44, 4  ;;  %v1013_v61 = vrot.slane %v1000_v48, 4  ;;  %v778_v62 = vrot.slane %v773_v49, 4 }
 0x146   : > { %v2269_v50 = vunpack.i.h.bf16 %v2267_v46  ;;  %v2268_v51 = vunpack.i.l.bf16 %v2267_v46 }
 0x148   : > { %v976_v53 = vrot.slane %v2269_v50, 4  ;;  %v980_v54 = vsel %vm754_vm1, %v2269_v50, %v979_v45  ;;  %v753_v55 = vrot.slane %v2268_v51, 4  ;;  %v757_v56 = vsel %vm754_vm1, %v2268_v51, %v756_v47 }
 0x149   : > { %v988_v59 = vperm.slane %v980_v54, %v2782_v35  ;;  %v765_v60 = vperm.slane %v757_v56, %v2782_v35 }
 0x14a   : > { %v978_v63 = vsel %vm754_vm1, %v976_v53, %v930_v15  ;;  %v755_v0 = vsel %vm754_vm1, %v753_v55, %v742_v16 }
 0x14b   : > { %v984_v1 = vperm.slane %v978_v63, %v2782_v35  ;;  %v1015_v2 = vrot.slane %v988_v59, 4  ;;  %v761_v3 = vperm.slane %v755_v0, %v2782_v35  ;;  %v791_v4 = vsel %vm754_vm1, %v790_v58, %v765_v60 }
 0x14c   : > { %v792_v5 = vrot.slane %v765_v60, 4  ;;  %v797_v6 = vperm.slane %v791_v4, %v2792_v52  ;;  %v1014_v7 = vsel %vm754_vm1, %v1013_v61, %v988_v59 }
 0x14d   : > { %v1003_v8 = vrot.slane %v984_v1, 4  ;;  %v779_v9 = vsel %vm754_vm1, %v778_v62, %v761_v3  ;;  %v780_v10 = vrot.slane %v761_v3, 4  ;;  %v1002_v11 = vsel %vm754_vm1, %v1001_v57, %v984_v1 }
 0x14e   : > { %v785_v12 = vperm.slane %v779_v9, %v2792_v52  ;;  %v793_v13 = vsel %vm754_vm1, %v777_v44, %v792_v5  ;;  %v806_v14 = vrot.slane %v797_v6, 4  ;;  %v1008_v15 = vperm.slane %v1002_v11, %v2792_v52 }
 0x14f   : > { %v781_v16 = vsel %vm754_vm1, %v773_v49, %v780_v10  ;;  %v801_v17 = vperm.slane %v793_v13, %v2792_v52  ;;  %v1004_v18 = vsel %vm754_vm1, %v996_v43, %v1003_v8  ;;  %v1016_v19 = vsel %vm754_vm1, %v1000_v48, %v1015_v2 }
 0x150   : > { %v789_v20 = vperm.slane %v781_v16, %v2792_v52  ;;  %v802_v21 = vrot.slane %v785_v12, 4  ;;  %v1012_v22 = vperm.slane %v1004_v18, %v2792_v52  ;;  %v807_v23 = vsel %vm754_vm1, 0.0, %v806_v14 }
 0x151   : > { %v808_v24 = vrot.slane %v801_v17, 4  ;;  %v1020_v25 = vperm.slane %v1014_v7, %v2792_v52  ;;  %v1024_v27 = vperm.slane %v1016_v19, %v2792_v52  ;;  %v1025_v30 = vrot.slane %v1008_v15, 4 }
 0x152   : > { %v803_v28 = vsel %vm754_vm1, 0.0, %v802_v21  ;;  %v804_v29 = vrot.slane %v789_v20, 4  ;;  %v1027_v31 = vrot.slane %v1012_v22, 4 }
 0x153   : > { %v809_v32 = vsel %vm754_vm1, 0.0, %v808_v24  ;;  %v821_v33 = vsel %vm754_vm1, %v808_v24, %v797_v6  ;;  %v1029_v34 = vrot.slane %v1020_v25, 4  ;;  %v1031_v36 = vrot.slane %v1024_v27, 4 }
 0x154   : > { %v805_v37 = vsel %vm754_vm1, 0.0, %v804_v29  ;;  %v810_v38 = vsel %vm754_vm1, %v804_v29, %v785_v12  ;;  %v825_v39 = vperm.slane %v821_v33, %v2782_v35  ;;  %v826_v40 = vrot.slane %v809_v32, 4 }
 0x155   : > { %v814_v41 = vperm.slane %v810_v38, %v2782_v35  ;;  %v815_v42 = vrot.slane %v805_v37, 4  ;;  %v1030_v43 = vsel %vm754_vm1, 0.0, %v1029_v34  ;;  %v1032_v44 = vsel %vm754_vm1, 0.0, %v1031_v36 }
 0x156   : > { %v827_v45 = vsel %vm754_vm1, %v826_v40, %v807_v23  ;;  %v846_v46 = vrot.slane %v825_v39, 4  ;;  %v1044_v47 = vsel %vm754_vm1, %v1031_v36, %v1020_v25  ;;  %v1049_v48 = vrot.slane %v1032_v44, 4 }
 0x157   : > { %v816_v49 = vsel %vm754_vm1, %v815_v42, %v803_v28  ;;  %v831_v50 = vperm.slane %v827_v45, %v2782_v35  ;;  %v834_v51 = vrot.slane %v814_v41, 4  ;;  %v1026_v53 = vsel %vm754_vm1, 0.0, %v1025_v30 }
 0x158   : > { %v820_v54 = vperm.slane %v816_v49, %v2782_v35  ;;  %v1028_v55 = vsel %vm754_vm1, 0.0, %v1027_v31  ;;  %v1033_v56 = vsel %vm754_vm1, %v1027_v31, %v1008_v15  ;;  %v1048_v57 = vperm.slane %v1044_v47, %v2782_v35 }
 0x159   : > { %v844_v58 = vrot.slane %v831_v50, 4  ;;  %v847_v59 = vsel %vm754_vm1, %v831_v50, %v846_v46  ;;  %v1037_v60 = vperm.slane %v1033_v56, %v2782_v35  ;;  %v1038_v61 = vrot.slane %v1028_v55, 4 }
 0x15a   : > { %v832_v62 = vrot.slane %v820_v54, 4  ;;  %v835_v63 = vsel %vm754_vm1, %v820_v54, %v834_v51  ;;  %v855_v0 = vperm.slane %v847_v59, %v2792_v52  ;;  %v1050_v1 = vsel %vm754_vm1, %v1049_v48, %v1030_v43 }
 0x15b   : > { %v843_v2 = vperm.slane %v835_v63, %v2792_v52  ;;  %v845_v3 = vsel %vm754_vm1, %v844_v58, %v825_v39  ;;  %v1039_v4 = vsel %vm754_vm1, %v1038_v61, %v1026_v53  ;;  %v1054_v5 = vperm.slane %v1050_v1, %v2782_v35 }
 0x15c   : > { %v833_v6 = vsel %vm754_vm1, %v832_v62, %v814_v41  ;;  %v851_v7 = vperm.slane %v845_v3, %v2792_v52  ;;  %v860_v8 = vrot.slane %v855_v0, 4  ;;  %v1043_v9 = vperm.slane %v1039_v4, %v2782_v35 }
 0x15d   : > { %v839_v10 = vperm.slane %v833_v6, %v2792_v52  ;;  %v862_v11 = vrot.slane %v843_v2, 4  ;;  %v1057_v12 = vrot.slane %v1037_v60, 4  ;;  %v1069_v13 = vrot.slane %v1048_v57, 4 }
 0x15e   : > { %v856_v14 = vrot.slane %v851_v7, 4  ;;  %v861_v15 = vsel %vm754_vm1, %v860_v8, %v843_v2  ;;  %v1055_v16 = vrot.slane %v1043_v9, 4  ;;  %v1067_v17 = vrot.slane %v1054_v5, 4 }
 0x15f   : > { %v858_v18 = vrot.slane %v839_v10, 4  ;;  %v863_v19 = vsel %vm754_vm1, %v855_v0, %v862_v11  ;;  %v866_v20 = vpack.c.bf16 %v861_v15, %v861_v15  ;;  %v1058_v21 = vsel %vm754_vm1, %v1043_v9, %v1057_v12  ;;  %v1093_v15 = vpop.permute.xlu2 %1092 }
 0x160   : > { %v857_v22 = vsel %vm754_vm1, %v856_v14, %v839_v10  ;;  %v867_v23 = vpack.c.bf16 %v863_v19, %v863_v19  ;;  %v1066_v24 = vperm.slane %v1058_v21, %v2792_v52  ;;  %v1070_v25 = vsel %vm754_vm1, %v1054_v5, %v1069_v13 }
 0x161   : > { %v859_v27 = vsel %vm754_vm1, %v851_v7, %v858_v18  ;;  %v864_v28 = vpack.c.bf16 %v857_v22, %v857_v22  ;;  %871 = vst.msk [vmem:[#allocation2 + $0x8] sm:$0xf] %vm868_vm2, %v866_v20  ;;  %v1078_v29 = vperm.slane %v1070_v25, %v2792_v52  ;;  %v1056_v30 = vsel %vm754_vm1, %v1055_v16, %v1037_v60 }
 0x162   : > { %v865_v31 = vpack.c.bf16 %v859_v27, %v859_v27  ;;  %872 = vst.msk [vmem:[#allocation2 + $0xc] sm:$0xf] %vm868_vm2, %v867_v23  ;;  %v1062_v32 = vperm.slane %v1056_v30, %v2792_v52  ;;  %v1068_v33 = vsel %vm754_vm1, %v1067_v17, %v1048_v57  ;;  %v1085_v34 = vrot.slane %v1066_v24, 4 }
 0x163   : > { %869 = vst.msk [vmem:[#allocation2] sm:$0xf] %vm868_vm2, %v864_v28  ;;  %v1083_v36 = vrot.slane %v1078_v29, 4  ;;  %v1074_v37 = vperm.slane %v1068_v33, %v2792_v52  ;;  %v1297_v57 = vlaneseq  ;;  %v2541_v2 = vmov -1e+30  }
 0x164   : > { %870 = vst.msk [vmem:[#allocation2 + $0x4] sm:$0xf] %vm868_vm2, %v865_v31  ;;  %v1086_v38 = vsel %vm754_vm1, %v1078_v29, %v1085_v34  ;;  %v1081_v39 = vrot.slane %v1062_v32, 4  ;;  %v2542_v13 = vmov 0   ;;  %v2543_v14 = vmov 0.0  }
 0x165   : > { %v1084_v40 = vsel %vm754_vm1, %v1083_v36, %v1066_v24  ;;  %v1079_v41 = vrot.slane %v1074_v37, 4  ;;  %v1090_v42 = vpack.c.bf16 %v1086_v38, %v1086_v38  ;;  %v1298_v58 = vshrl.u32 %v1297_v57, 7  ;;  %876 = vst.msk [vmem:[#allocation3 + $0x10] sm:$0xff] %vm873_vm5, %v2541_v2  ;;  %2276 = vset.pattern.permute.xlu0 %v2542_v13  ;;  %2277 = vset.pattern.permute.xlu2 %v2542_v13 }
 0x166   : > { %v1089_v43 = vpack.c.bf16 %v1084_v40, %v1084_v40  ;;  %v1082_v44 = vsel %vm754_vm1, %v1074_v37, %v1081_v39  ;;  %v1302_v59 = vand.u32 127, %v1297_v57  ;;  %874 = vst.msk [vmem:[#allocation3] sm:$0xff] %vm873_vm5, %v2541_v2  ;;  %2275 = vset.pattern.permute.xlu1 %v2542_v13  ;;  %v1103_v28 = vrot.slane %v2779_v26, 4 }
 0x167   : > { %v1080_v45 = vsel %vm754_vm1, %v1079_v41, %v1062_v32  ;;  %v1281_v46 = vsel %vm882_vm3, %v1090_v42, 0  ;;  %v1088_v47 = vpack.c.bf16 %v1082_v44, %v1082_v44  ;;  %875 = vst.msk [vmem:[#allocation3 + $0x8] sm:$0xff] %vm873_vm5, %v2541_v2  ;;  %v1096_v16 = vpop.permute.xlu2 %1095  ;;  %v1115_v40 = vrot.slane %v1093_v15, 4 }
 0x168   : > { %v1262_v48 = vsel %vm882_vm3, %v1089_v43, 0  ;;  %v1087_v49 = vpack.c.bf16 %v1080_v45, %v1080_v45  ;;  %1290 = vmatpush.bf16.xpose.msrb.mxu2 %v1281_v46  ;;  %v1217_v54 = vld [vmem:[#allocation2 + $0x8] sm:$0xf]  ;;  %vm1305_vm4 = vcmp.gt.s32.totalorder %v1302_v59, %v1298_v58  ;;  %877 = vst.msk [vmem:[#allocation3 + $0x18] sm:$0xff] %vm873_vm5, %v2541_v2  ;;  %v1101_v31 = vrot.slane %v1096_v16, 4 }
 0x169   : > { %1271 = vmatpush.bf16.xpose.msrb.mxu1 %v1262_v48  ;;  %v1243_v50 = vsel %vm882_vm3, %v1088_v47, 0  ;;  %v1218_v53 = vld [vmem:[#allocation2 + $0xc] sm:$0xf]  ;;  %881 = vst.msk [vmem:[#allocation4 + $0x18] sm:$0xff] %vm873_vm5, %v2543_v14  ;;  %v1104_v34 = vsel %vm754_vm1, %v1096_v16, %v1103_v28 }
 0x16a   : > { %v1224_v51 = vsel %vm882_vm3, %v1087_v49, 0  ;;  %1252 = vmatpush.bf16.xpose.msrb.mxu0 %v1243_v50  ;;  %v1215_v56 = vld [vmem:[#allocation2] sm:$0xf]  ;;  %878 = vst.msk [vmem:[#allocation4] sm:$0xff] %vm873_vm5, %v2543_v14  ;;  %v1102_v38 = vsel %vm754_vm1, %v1101_v31, %v2779_v26  ;;  %v1112_v39 = vperm.slane %v1104_v34, %v2782_v35 }
 0x16b   : > { %1233 = vmatpush.bf16.xpose.msra.mxu3 %v1224_v51  ;;  %v1216_v55 = vld [vmem:[#allocation2 + $0x4] sm:$0xf]  ;;  %879 = vst.msk [vmem:[#allocation4 + $0x8] sm:$0xff] %vm873_vm5, %v2543_v14  ;;  %v1108_v41 = vperm.slane %v1102_v38, %v2782_v35 }
 0x16c   : > { %880 = vst.msk [vmem:[#allocation4 + $0x10] sm:$0xff] %vm873_vm5, %v2543_v14  ;;  %v2914_v17 = vld [vmem:[#allocation3 + $0x10] sm:$0xff]  ;;  %v1139_v45 = vrot.slane %v1112_v39, 4 }
 0x16d   : > { %883 = vst.msk [vmem:[#allocation5] sm:$0xff] %vm882_vm3, %v2543_v14  ;;  %v2935_v27 = vld [vmem:[#allocation3] sm:$0xff]  ;;  %v1127_v48 = vrot.slane %v1108_v41, 4 }
 0x16e   : > { %884 = vst.msk [vmem:[#allocation5 + $0x8] sm:$0xff] %vm882_vm3, %v2543_v14  ;;  %v2916_v18 = vld [vmem:[#allocation3 + $0x8] sm:$0xff] }
 0x16f   : > { %2092 = vmatmul.msk.bf16.vlgmr.msrb.gmra.mxu2 %vm882_vm3, %v1218_v53  ;;  %885 = vst.msk [vmem:[#allocation5 + $0x10] sm:$0xff] %vm882_vm3, %v2543_v14  ;;  %v2933_v25 = vld [vmem:[#allocation3 + $0x18] sm:$0xff] }
 0x170   : > { %2091 = vmatmul.msk.bf16.vlgmr.msrb.gmra.mxu1 %vm882_vm3, %v1217_v54  ;;  %886 = vst.msk [vmem:[#allocation5 + $0x18] sm:$0xff] %vm882_vm3, %v2543_v14 }
 0x171   : > { %2090 = vmatmul.msk.bf16.vlgmr.msrb.gmra.mxu0 %vm882_vm3, %v1216_v55 }
 0x172   : > { %2089 = vmatmul.msk.bf16.vlgmr.msra.gmra.mxu3 %vm882_vm3, %v1215_v56 }
 0x1ed   : > { %v1273_v60 = vpop.f32.mrf.mxu1 }
 0x1ee   : > { %v2881_v61 = vsel %vm1305_vm4, -1e+30, %v1273_v60  ;;  %v1254_v62 = vpop.f32.mrf.mxu0 }
 0x1ef   : > { %v1322_v63 = vsel %vm882_vm3, %v2881_v61, -inf  ;;  %v2886_v0 = vsel %vm1305_vm4, -1e+30, %v1254_v62 }
 0x1f0   : > { %1323 = vmax.xlane.f32.xlu2 %v1322_v63  ;;  %v1319_v1 = vsel %vm882_vm3, %v2886_v0, -inf }
 0x1f1   : > { %1320 = vmax.xlane.f32.xlu0 %v1319_v1 }
 0x1f2   : > { %v1292_v3 = vpop.f32.mrf.mxu2 }
 0x1f3   : > { %v2893_v4 = vsel %vm1305_vm4, -1e+30, %v1292_v3 }
 0x1f4   : > { %v1325_v7 = vsel %vm882_vm3, %v2893_v4, -inf }
 0x1f5   : > { %v1235_v5 = vpop.f32.mrf.mxu3  ;;  %v1275_v6 = vpop.f32.mrf.mxu1 }
 0x1f6   : > { %v2900_v8 = vsel %vm1305_vm4, -1e+30, %v1235_v5  ;;  %v1256_v9 = vpop.f32.mrf.mxu0 }
 0x1f7   : > { %v1316_v10 = vsel %vm882_vm3, %v2900_v8, -inf }
 0x1f8   : > { %1326 = vmax.xlane.f32.xlu2 %v1325_v7  ;;  %1317 = vmax.xlane.f32.xlu1 %v1316_v10 }
 0x1fa   : > { %v1294_v11 = vpop.f32.mrf.mxu2 }
 0x1fd   : > { %v1237_v12 = vpop.f32.mrf.mxu3 }
 0x210   : > { %1098 = vrot.lane.b32.xlu2 %v2779_v26, %s2536_s17 }
 0x263   : > { %v1324_v19 = vpop.xlane.xlu2 %1323 }
 0x264   : > { %v2919_v20 = vmax.f32 %v2914_v17, %v1324_v19  ;;  %v1321_v21 = vpop.xlane.xlu0 %1320 }
 0x265   : > { %v2922_v22 = vmax.f32 %v2916_v18, %v1321_v21 }
 0x266   : > { %v1334_v23 = vsub.f32 %v2914_v17, %v2919_v20  ;;  %1524 = vst.msk [vmem:[#allocation3 + $0x10] sm:$0xff] %vm873_vm5, %v2919_v20  ;;  %1356 = vperm.xlu0 %2276, %v2919_v20   ;;  %v1378_v17 = vld [vmem:[#allocation4 + $0x10] sm:$0xff] }
 0x267   : > { %v1333_v24 = vsub.f32 %v2916_v18, %v2922_v22  ;;  %1523 = vst.msk [vmem:[#allocation3 + $0x8] sm:$0xff] %vm873_vm5, %v2922_v22  ;;  %v1408_v18 = vld [vmem:[#allocation5 + $0x18] sm:$0xff] }
 0x26b   : > { %v1327_v29 = vpop.xlane.xlu2 %1326  ;;  %v1318_v30 = vpop.xlane.xlu1 %1317 }
 0x26c   : > { %v2939_v32 = vmax.f32 %v2933_v25, %v1327_v29  ;;  %v2942_v33 = vmax.f32 %v2935_v27, %v1318_v30 }
 0x26e   : > { %v1335_v36 = vsub.f32 %v2933_v25, %v2939_v32  ;;  %1525 = vst.msk [vmem:[#allocation3 + $0x18] sm:$0xff] %vm873_vm5, %v2939_v32  ;;  %v1332_v37 = vsub.f32 %v2935_v27, %v2942_v33  ;;  %1361 = vperm.xlu2 %2277, %v2939_v32   ;;  %1346 = vperm.xlu1 %2275, %v2942_v33  }
 0x26f   : > { %1522 = vst.msk [vmem:[#allocation3] sm:$0xff] %vm873_vm5, %v2942_v33 }
 0x273   : > { %v1099_v42 = vpop.permute.xlu2 %1098 }
 0x274   : > { %v1113_v43 = vrot.slane %v1099_v42, 4  ;;  %v1116_v44 = vsel %vm754_vm1, %v1099_v42, %v1115_v40 }
 0x275   : > { %v1124_v46 = vperm.slane %v1116_v44, %v2782_v35 }
 0x276   : > { %v1114_v47 = vsel %vm754_vm1, %v1113_v43, %v1093_v15  ;;  %1351 = vperm.xlu2 %2277, %v2922_v22  }
 0x277   : > { %v1120_v49 = vperm.slane %v1114_v47, %v2782_v35  ;;  %v1137_v26 = vrot.slane %v1124_v46, 4  ;;  %v1140_v50 = vsel %vm754_vm1, %v1124_v46, %v1139_v45 }
 0x278   : > { %v1148_v51 = vperm.slane %v1140_v50, %v2792_v52 }
 0x279   : > { %v1125_v53 = vrot.slane %v1120_v49, 4  ;;  %v1128_v54 = vsel %vm754_vm1, %v1120_v49, %v1127_v48  ;;  %v1138_v55 = vsel %vm754_vm1, %v1137_v26, %v1112_v39 }
 0x27a   : > { %v1136_v56 = vperm.slane %v1128_v54, %v2792_v52  ;;  %v1144_v57 = vperm.slane %v1138_v55, %v2792_v52  ;;  %v1155_v58 = vrot.slane %v1148_v51, 4 }
 0x27b   : > { %v1126_v59 = vsel %vm754_vm1, %v1125_v53, %v1108_v41 }
 0x27c   : > { %v1132_v60 = vperm.slane %v1126_v59, %v2792_v52  ;;  %v1151_v62 = vrot.slane %v1136_v56, 4  ;;  %v1153_v63 = vrot.slane %v1144_v57, 4  ;;  %v1156_v1 = vsel %vm754_vm1, 0.0, %v1155_v58 }
 0x27d   : > { %v1168_v2 = vsel %vm754_vm1, %v1155_v58, %v1144_v57  ;;  %v1173_v3 = vrot.slane %v1156_v1, 4 }
 0x27e   : > { %v1149_v5 = vrot.slane %v1132_v60, 4  ;;  %v1152_v6 = vsel %vm754_vm1, 0.0, %v1151_v62  ;;  %v1154_v7 = vsel %vm754_vm1, 0.0, %v1153_v63  ;;  %v1157_v9 = vsel %vm754_vm1, %v1151_v62, %v1132_v60 }
 0x27f   : > { %v1162_v10 = vrot.slane %v1152_v6, 4  ;;  %v1172_v11 = vperm.slane %v1168_v2, %v2782_v35  ;;  %v1174_v12 = vsel %vm754_vm1, %v1173_v3, %v1154_v7  ;;  %v1161_v13 = vperm.slane %v1157_v9, %v2782_v35 }
 0x280   : > { %v1150_v14 = vsel %vm754_vm1, 0.0, %v1149_v5  ;;  %v1178_v15 = vperm.slane %v1174_v12, %v2782_v35 }
 0x281   : > { %v1193_v16 = vrot.slane %v1172_v11, 4  ;;  %v1163_v19 = vsel %vm754_vm1, %v1162_v10, %v1150_v14  ;;  %v1181_v21 = vrot.slane %v1161_v13, 4 }
 0x282   : > { %v1167_v28 = vperm.slane %v1163_v19, %v2782_v35  ;;  %v1191_v29 = vrot.slane %v1178_v15, 4 }
 0x283   : > { %v1194_v30 = vsel %vm754_vm1, %v1178_v15, %v1193_v16 }
 0x284   : > { %v1182_v31 = vsel %vm754_vm1, %v1167_v28, %v1181_v21  ;;  %v1202_v34 = vperm.slane %v1194_v30, %v2792_v52  ;;  %v1179_v38 = vrot.slane %v1167_v28, 4  ;;  %v1192_v39 = vsel %vm754_vm1, %v1191_v29, %v1172_v11 }
 0x285   : > { %v1190_v40 = vperm.slane %v1182_v31, %v2792_v52  ;;  %v1198_v41 = vperm.slane %v1192_v39, %v2792_v52  ;;  %v1340_v29 = vmul.f32 1.442695, %v1334_v23  ;;  %v1338_v30 = vmul.f32 1.442695, %v1333_v24  ;;  %v1379_v39 = vld [vmem:[#allocation4 + $0x18] sm:$0xff] }
 0x286   : > { %v1207_v42 = vrot.slane %v1202_v34, 4  ;;  %v1180_v43 = vsel %vm754_vm1, %v1179_v38, %v1161_v13 }
 0x287   : > { %v1186_v44 = vperm.slane %v1180_v43, %v2792_v52  ;;  %v1203_v45 = vrot.slane %v1198_v41, 4  ;;  %v1209_v46 = vrot.slane %v1190_v40, 4  ;;  %v1377_v43 = vld [vmem:[#allocation4 + $0x8] sm:$0xff] }
 0x288   : > { %v1208_v47 = vsel %vm754_vm1, %v1207_v42, %v1190_v40 }
 0x289   : > { %v1213_v48 = vpack.c.bf16 %v1208_v47, %v1208_v47  ;;  %v1204_v49 = vsel %vm754_vm1, %v1203_v45, %v1186_v44  ;;  %v1205_v26 = vrot.slane %v1186_v44, 4  ;;  %v1210_v50 = vsel %vm754_vm1, %v1202_v34, %v1209_v46  ;;  %v1376_v44 = vld [vmem:[#allocation4] sm:$0xff] }
 0x28a   : > { %v1211_v51 = vpack.c.bf16 %v1204_v49, %v1204_v49  ;;  %v1214_v53 = vpack.c.bf16 %v1210_v50, %v1210_v50 }
 0x28b   : > { %v1480_v54 = vsel %vm1440_vm6, %v1213_v48, 0  ;;  %v1206_v55 = vsel %vm754_vm1, %v1198_v41, %v1205_v26 }
 0x28c   : > { %1489 = vmatpush.bf16.msra.mxu1 %v1480_v54  ;;  %v1442_v56 = vsel %vm1440_vm6, %v1211_v51, 0  ;;  %v1499_v57 = vsel %vm1440_vm6, %v1214_v53, 0  ;;  %v1212_v58 = vpack.c.bf16 %v1206_v55, %v1206_v55 }
 0x28d   : > { %1451 = vmatpush.bf16.msrb.mxu3 %v1442_v56  ;;  %1508 = vmatpush.bf16.msra.mxu2 %v1499_v57 }
 0x28e   : > { %v1461_v59 = vsel %vm1440_vm6, %v1212_v58, 0 }
 0x28f   : > { %1470 = vmatpush.bf16.msra.mxu0 %v1461_v59 }
 0x2c8   : > { %v1362_v60 = vpop.permute.xlu2 %1361 }
 0x2c9   : > { %v1367_v62 = vsub.f32 %v2893_v4, %v1362_v60  ;;  %v1405_v60 = vld [vmem:[#allocation5] sm:$0xff] }
 0x2cb   : > { %v1374_v63 = vmul.f32 1.442695, %v1367_v62 }
 0x2cd   : > { %2288 = vpow2.f32 %v1374_v63 }
 0x2d0   : > { %v1352_v1 = vpop.permute.xlu2 %1351 }
 0x2d1   : > { %v1365_v2 = vsub.f32 %v2886_v0, %v1352_v1  ;;  %v1342_v0 = vmul.f32 1.442695, %v1335_v36 }
 0x2d3   : > { %v2289_v3 = vpop.eup %2288  ;;  %v1370_v5 = vmul.f32 1.442695, %v1365_v2 }
 0x2d4   : > { %v1436_v6 = vpack.c.bf16 %v2289_v3, %v2289_v3  ;;  %v1393_v7 = vsel %vm882_vm3, %v2289_v3, 0.0 }
 0x2d5   : > { %2290 = vpow2.f32 %v1370_v5  ;;  %1394 = vadd.xlane.f32.xlu0 %v1393_v7  ;;  %v1407_v7 = vld [vmem:[#allocation5 + $0x10] sm:$0xff] }
 0x2d6   : > { %2096 = vmatmul.msk.bf16.vlgmr.msra.gmra.mxu2 %vm882_vm3, %v1436_v6 }
 0x2d8   : > { %v1357_v9 = vpop.permute.xlu0 %1356 }
 0x2d9   : > { %v1366_v10 = vsub.f32 %v2881_v61, %v1357_v9 }
 0x2db   : > { %v2291_v11 = vpop.eup %2290  ;;  %v1372_v12 = vmul.f32 1.442695, %v1366_v10 }
 0x2dc   : > { %v1434_v4 = vpack.c.bf16 %v2291_v11, %v2291_v11  ;;  %v1387_v25 = vsel %vm882_vm3, %v2291_v11, 0.0 }
 0x2dd   : > { %2292 = vpow2.f32 %v1372_v12 }
 0x2de   : > { %2094 = vmatmul.msk.bf16.vlgmr.msra.gmra.mxu0 %vm882_vm3, %v1434_v4  ;;  %2294 = vpow2.f32 %v1342_v0  ;;  %v1406_v0 = vld [vmem:[#allocation5 + $0x8] sm:$0xff] }
 0x2e0   : > { %v1347_v13 = vpop.permute.xlu1 %1346 }
 0x2e1   : > { %v1364_v14 = vsub.f32 %v2900_v8, %v1347_v13  ;;  %v1336_v8 = vmul.f32 1.442695, %v1332_v37 }
 0x2e3   : > { %v2293_v15 = vpop.eup %2292  ;;  %v1368_v16 = vmul.f32 1.442695, %v1364_v14 }
 0x2e4   : > { %v1435_v19 = vpack.c.bf16 %v2293_v15, %v2293_v15  ;;  %v1390_v21 = vsel %vm882_vm3, %v2293_v15, 0.0  ;;  %v2295_v61 = vpop.eup %2294 }
 0x2e5   : > { %2296 = vpow2.f32 %v1368_v16  ;;  %1391 = vadd.xlane.f32.xlu2 %v1390_v21  ;;  %v1383_v27 = vmul.f32 %v2295_v61, %v1379_v39 }
 0x2e6   : > { %2095 = vmatmul.msk.bf16.vlgmr.msra.gmra.mxu1 %vm882_vm3, %v1435_v19  ;;  %2298 = vpow2.f32 %v1336_v8 }
 0x2e7   : > { %2300 = vpow2.f32 %v1340_v29 }
 0x2e8   : > { %2302 = vpow2.f32 %v1338_v30 }
 0x2e9   : > { %1426 = vperm.xlu0 %2276, %v2295_v61  }
 0x2eb   : > { %v2297_v28 = vpop.eup %2296 }
 0x2ec   : > { %v1384_v32 = vsel %vm882_vm3, %v2297_v28, 0.0  ;;  %v1433_v36 = vpack.c.bf16 %v2297_v28, %v2297_v28  ;;  %v2299_v31 = vpop.eup %2298 }
 0x2ed   : > { %1388 = vadd.xlane.f32.xlu2 %v1387_v25  ;;  %1385 = vadd.xlane.f32.xlu1 %v1384_v32  ;;  %v2301_v34 = vpop.eup %2300  ;;  %v1380_v47 = vmul.f32 %v2299_v31, %v1376_v44 }
 0x2ee   : > { %2093 = vmatmul.msk.bf16.vlgmr.msrb.gmra.mxu3 %vm882_vm3, %v1433_v36  ;;  %v2303_v38 = vpop.eup %2302  ;;  %v1382_v20 = vmul.f32 %v2301_v34, %v1378_v17 }
 0x2ef   : > { %v1381_v46 = vmul.f32 %v2303_v38, %v1377_v43 }
 0x305   : > { %1411 = vperm.xlu2 %2277, %v2299_v31  }
 0x306   : > { %1421 = vperm.xlu1 %2275, %v2301_v34  }
 0x30e   : > { %1416 = vperm.xlu1 %2275, %v2303_v38  }
 0x348   : > { %v1395_v33 = vpop.xlane.xlu0 %1394 }
 0x349   : > { %v1399_v37 = vadd.f32 %v1395_v33, %v1383_v27 }
 0x34b   : > { %1404 = vst.msk [vmem:[#allocation4 + $0x18] sm:$0xff] %vm873_vm5, %v1399_v37 }
 0x352   : > { %v1536_v56 = vld [vmem:[#allocation4 + $0x18] sm:$0xff] }
 0x358   : > { %v1392_v23 = vpop.xlane.xlu2 %1391 }
 0x359   : > { %v1398_v40 = vadd.f32 %v1392_v23, %v1382_v20  ;;  %v1510_v41 = vpop.f32.mrf.mxu2 }
 0x35b   : > { %1403 = vst.msk [vmem:[#allocation4 + $0x10] sm:$0xff] %vm873_vm5, %v1398_v40  ;;  %v1427_v22 = vpop.permute.xlu0 %1426  ;;  %v1472_v24 = vpop.f32.mrf.mxu0 }
 0x35c   : > { %v1432_v42 = vmul.f32 %v1427_v22, %v1408_v18 }
 0x35e   : > { %v1517_v45 = vadd.f32 %v1510_v41, %v1432_v42 }
 0x360   : > { %1521 = vst.msk [vmem:[#allocation5 + $0x18] sm:$0xff] %vm882_vm3, %v1517_v45  ;;  %v1389_v48 = vpop.xlane.xlu2 %1388  ;;  %v1386_v49 = vpop.xlane.xlu1 %1385 }
 0x361   : > { %v1397_v26 = vadd.f32 %v1389_v48, %v1381_v46  ;;  %v1396_v50 = vadd.f32 %v1386_v49, %v1380_v47  ;;  %v1512_v51 = vpop.f32.mrf.mxu2 }
 0x362   : > { %v1535_v53 = vld [vmem:[#allocation4 + $0x10] sm:$0xff] }
 0x363   : > { %1402 = vst.msk [vmem:[#allocation4 + $0x8] sm:$0xff] %vm873_vm5, %v1397_v26  ;;  %v1474_v54 = vpop.f32.mrf.mxu0  ;;  %v1491_v55 = vpop.f32.mrf.mxu1  ;;  %2304 = vrcp.f32 %v1535_v53 }
 0x364   : > { %1401 = vst.msk [vmem:[#allocation4] sm:$0xff] %vm873_vm5, %v1396_v50  ;;  %2306 = vrcp.f32 %v1536_v56 }
 0x367   : > { %v1532_v29 = vld [vmem:[#allocation5 + $0x18] sm:$0xff] }
 0x368   : > { %v1412_v62 = vpop.permute.xlu2 %1411 }
 0x369   : > { %v2305_v57 = vpop.eup %2304  ;;  %v1429_v63 = vmul.f32 %v1412_v62, %v1405_v60 }
 0x36a   : > { %1553 = vperm.xlu2 %2277, %v2305_v57   ;;  %v2307_v1 = vpop.eup %2306  ;;  %v1534_v3 = vld [vmem:[#allocation4 + $0x8] sm:$0xff] }
 0x36b   : > { %v1493_v58 = vpop.f32.mrf.mxu1  ;;  %v1533_v59 = vld [vmem:[#allocation4] sm:$0xff] }
 0x36c   : > { %2308 = vrcp.f32 %v1533_v59 }
 0x36d   : > { %2310 = vrcp.f32 %v1534_v3 }
 0x371   : > { %v1453_v2 = vpop.f32.mrf.mxu3 }
 0x372   : > { %v2309_v5 = vpop.eup %2308  ;;  %v1514_v6 = vadd.f32 %v1453_v2, %v1429_v63  ;;  %1558 = vperm.xlu2 %2277, %v2307_v1  }
 0x373   : > { %1543 = vperm.xlu1 %2275, %v2309_v5   ;;  %v2311_v12 = vpop.eup %2310 }
 0x374   : > { %1518 = vst.msk [vmem:[#allocation5] sm:$0xff] %vm882_vm3, %v1514_v6 }
 0x378   : > { %v1422_v9 = vpop.permute.xlu1 %1421 }
 0x379   : > { %v1431_v10 = vmul.f32 %v1422_v9, %v1407_v7  ;;  %v1455_v11 = vpop.f32.mrf.mxu3 }
 0x37b   : > { %v1516_v4 = vadd.f32 %v1491_v55, %v1431_v10  ;;  %1548 = vperm.xlu1 %2275, %v2311_v12   ;;  %v1529_v28 = vld [vmem:[#allocation5] sm:$0xff] }
 0x37d   : > { %1520 = vst.msk [vmem:[#allocation5 + $0x10] sm:$0xff] %vm882_vm3, %v1516_v4 }
 0x380   : > { %v1417_v13 = vpop.permute.xlu1 %1416 }
 0x381   : > { %v1430_v14 = vmul.f32 %v1417_v13, %v1406_v0 }
 0x383   : > { %v1515_v15 = vadd.f32 %v1472_v24, %v1430_v14 }
 0x384   : > { %v1531_v19 = vld [vmem:[#allocation5 + $0x10] sm:$0xff] }
 0x385   : > { %1519 = vst.msk [vmem:[#allocation5 + $0x8] sm:$0xff] %vm882_vm3, %v1515_v15 }
 0x38c   : > { %v1530_v39 = vld [vmem:[#allocation5 + $0x8] sm:$0xff] }
 0x3c4   : > { %v1554_v16 = vpop.permute.xlu2 %1553 }
 0x3c5   : > { %v1563_v21 = vmul.f32 %v1554_v16, %v1531_v19 }
 0x3c7   : > { %v1565_v36 = vrot.slane %v1563_v21, 4 }
 0x3cc   : > { %v1559_v32 = vpop.permute.xlu2 %1558 }
 0x3cd   : > { %v1564_v30 = vmul.f32 %v1559_v32, %v1532_v29 }
 0x3cf   : > { %v1578_v33 = vrot.slane %v1564_v30, 4 }
 0x3e5   : > { %v1544_v61 = vpop.permute.xlu1 %1543 }
 0x3e6   : > { %v1561_v25 = vmul.f32 %v1544_v61, %v1529_v28 }
 0x3e8   : > { %v1568_v8 = vrot.slane %v1561_v25, 4  ;;  %v1567_v31 = vsel %vm754_vm1, %v1565_v36, %v1561_v25 }
 0x3e9   : > { %v1573_v38 = vperm.slane %v1567_v31, %v2782_v35  ;;  %v2143_v31 = vld [vmem:[#allocation11 + $0x8] sm:$0xff] }
 0x3ea   : > { %v1569_v34 = vsel %vm754_vm1, %v1563_v21, %v1568_v8  ;;  %1726 = vmatpush.bf16.msra.mxu3 %v2143_v31 }
 0x3eb   : > { %v1577_v17 = vperm.slane %v1569_v34, %v2782_v35  ;;  %v1592_v40 = vrot.slane %v1573_v38, 4  ;;  %v2142_v34 = vld [vmem:[#allocation11] sm:$0xff] }
 0x3ed   : > { %v1549_v27 = vpop.permute.xlu1 %1548  ;;  %v1604_v22 = vrot.slane %v1577_v17, 4 }
 0x3ee   : > { %v1562_v37 = vmul.f32 %v1549_v27, %v1530_v39  ;;  %1727 = vmatpush.bf16.msra.mxu3 %v2142_v34 }
 0x3f0   : > { %v1579_v20 = vsel %vm754_vm1, %v1578_v33, %v1562_v37  ;;  %v1580_v23 = vrot.slane %v1562_v37, 4 }
 0x3f1   : > { %v1585_v41 = vperm.slane %v1579_v20, %v2782_v35  ;;  %v2281_v20 = vld [vmem:[%s3156_s9] ss:$0 sm:$0xff] }
 0x3f2   : > { %v1581_v18 = vsel %vm754_vm1, %v1564_v30, %v1580_v23 }
 0x3f3   : > { %v1589_v24 = vperm.slane %v1581_v18, %v2782_v35  ;;  %v1590_v42 = vrot.slane %v1585_v41, 4  ;;  %v1593_v43 = vsel %vm754_vm1, %v1585_v41, %v1592_v40  ;;  %v1694_v40 = vld [vmem:[%s2753_s29] sm:$0xff]  ;;  %s681_s29 = sand.u32 1, %s3204_s0  }
 0x3f4   : > { %v1601_v44 = vperm.slane %v1593_v43, %v2792_v52  ;;  %s2059_s27 = sshll.u32 %s681_s29, 3  ;;  %s1900_s0 = scalar_lea.sflag [#allocation8], %s681_s29 }
 0x3f5   : > { %v1591_v45 = vsel %vm754_vm1, %v1590_v42, %v1573_v38  ;;  %v1602_v46 = vrot.slane %v1589_v24, 4  ;;  %v1605_v47 = vsel %vm754_vm1, %v1589_v24, %v1604_v22  ;;  %v2547_v42 = vmov 32.0  }
 0x3f6   : > { %v1597_v48 = vperm.slane %v1591_v45, %v2792_v52  ;;  %v1613_v49 = vperm.slane %v1605_v47, %v2792_v52  ;;  %v1616_v26 = vrot.slane %v1601_v44, 4  ;;  %2312 = vrcp.f32 %v2547_v42 }
 0x3f7   : > { %v1603_v50 = vsel %vm754_vm1, %v1602_v46, %v1577_v17 }
 0x3f8   : > { %v1609_v51 = vperm.slane %v1603_v50, %v2792_v52  ;;  %v1614_v53 = vrot.slane %v1597_v48, 4  ;;  %v1617_v54 = vsel %vm754_vm1, 0.0, %v1616_v26  ;;  %v1620_v55 = vrot.slane %v1613_v49, 4 }
 0x3f9   : > { %v1622_v56 = vsel %vm754_vm1, %v1616_v26, %v1597_v48  ;;  %v1627_v57 = vrot.slane %v1617_v54, 4  ;;  %v2145_v54 = vld [vmem:[#allocation12 + $0x8] sm:$0xff] }
 0x3fa   : > { %v1621_v58 = vsel %vm754_vm1, 0.0, %v1620_v55  ;;  %v1615_v59 = vsel %vm754_vm1, 0.0, %v1614_v53  ;;  %v1618_v60 = vrot.slane %v1609_v51, 4  ;;  %v1626_v62 = vperm.slane %v1622_v56, %v2782_v35  ;;  %1803 = vmatpush.bf16.msrb.mxu0 %v2145_v54  ;;  %v2149_v56 = vld [vmem:[%s3159_s12 + $0x18] sm:$0xff] }
 0x3fb   : > { %v1638_v63 = vrot.slane %v1621_v58, 4  ;;  %v1628_v1 = vsel %vm754_vm1, %v1627_v57, %v1615_v59  ;;  %v1633_v2 = vsel %vm754_vm1, %v1620_v55, %v1609_v51  ;;  %v2144_v55 = vld [vmem:[#allocation12] sm:$0xff]  ;;  %1856 = vmatpush.bf16.msrb.mxu1 %v2149_v56  ;;  %v2148_v59 = vld [vmem:[%s3159_s12 + $0x10] sm:$0xff] }
 0x3fc   : > { %v1619_v3 = vsel %vm754_vm1, 0.0, %v1618_v60  ;;  %v1632_v5 = vperm.slane %v1628_v1, %v2782_v35  ;;  %v1637_v6 = vperm.slane %v1633_v2, %v2782_v35  ;;  %v1646_v7 = vrot.slane %v1626_v62, 4  ;;  %v2313_v43 = vpop.eup %2312 }
 0x3fd   : > { %v1639_v9 = vsel %vm754_vm1, %v1638_v63, %v1619_v3  ;;  %v1740_v44 = vmul.f32 32.0, %v2313_v43  ;;  %vm1744_vm9 = vweird.f32 %v2313_v43 }
 0x3fe   : > { %v1643_v10 = vperm.slane %v1639_v9, %v2782_v35  ;;  %v1647_v11 = vsel %vm754_vm1, %v1632_v5, %v1646_v7  ;;  %v1658_v12 = vrot.slane %v1637_v6, 4  ;;  %v1644_v4 = vrot.slane %v1632_v5, 4  ;;  %1804 = vmatpush.bf16.msrb.mxu0 %v2144_v55  ;;  %v2283_v9 = vld [vmem:[%s3162_s15] ss:$0 sm:$0xff] }
 0x3ff   : > { %v1655_v0 = vperm.slane %v1647_v11, %v2792_v52  ;;  %v1741_v45 = vsub.f32 1.0, %v1740_v44  ;;  %1857 = vmatpush.bf16.msrb.mxu1 %v2148_v59 }
 0x400   : > { %v1659_v13 = vsel %vm754_vm1, %v1643_v10, %v1658_v12  ;;  %v1645_v14 = vsel %vm754_vm1, %v1644_v4, %v1626_v62  ;;  %v1656_v15 = vrot.slane %v1643_v10, 4 }
 0x401   : > { %v1667_v16 = vperm.slane %v1659_v13, %v2792_v52  ;;  %v1674_v19 = vrot.slane %v1655_v0, 4  ;;  %v1651_v21 = vperm.slane %v1645_v14, %v2792_v52  ;;  %v1742_v46 = vmul.f32 %v2313_v43, %v1741_v45  ;;  %v2146_v13 = vld [vmem:[%s3159_s12] sm:$0xff] }
 0x402   : > { %v1657_v61 = vsel %vm754_vm1, %v1656_v15, %v1637_v6  ;;  %v2282_v6 = vld [vmem:[%s3161_s14] ss:$0 sm:$0xff] }
 0x403   : > { %v1675_v35 = vsel %vm754_vm1, %v1667_v16, %v1674_v19  ;;  %v1672_v28 = vrot.slane %v1667_v16, 4  ;;  %v1663_v25 = vperm.slane %v1657_v61, %v2792_v52  ;;  %v1670_v32 = vrot.slane %v1651_v21, 4  ;;  %v2284_v14 = vld [vmem:[%s3158_s11] ss:$0 sm:$0xff] }
 0x404   : > { %1685 = vrot.lane.b32.xlu1 %v1675_v35, %s2544_s26  ;;  %v1743_v47 = vadd.f32 %v2313_v43, %v1742_v46  ;;  %v2285_v35 = vld [vmem:[%s3160_s13] ss:$0 sm:$0xff] }
 0x405   : > { %v1673_v36 = vsel %vm754_vm1, %v1672_v28, %v1655_v0  ;;  %v1668_v8 = vrot.slane %v1663_v25, 4  ;;  %v1671_v29 = vsel %vm754_vm1, %v1663_v25, %v1670_v32  ;;  %v2147_v0 = vld [vmem:[%s3159_s12 + $0x8] sm:$0xff] }
 0x406   : > { %1681 = vrot.lane.b32.xlu2 %v1673_v36, %s2545_s22  ;;  %1677 = vrot.lane.b32.xlu0 %v1671_v29, %s2546_s20  ;;  %v1745_v48 = vsel %vm1744_vm9, %v2313_v43, %v1743_v47  ;;  %s3208_s22 = sld [smem:[#allocation33_spill]]  ;;  %s683_s20 = scalar_lea.vmem [#allocation14], %s2059_s27 }
 0x407   : > { %v1669_v30 = vsel %vm754_vm1, %v1668_v8, %v1651_v21  ;;  %1858 = vmatpush.bf16.msrb.mxu1 %v2147_v0  ;;  %s1913_s30 = sshll.u32 %s683_s20, 4  ;;  %s2458_s27 = scalar_lea.hbm %s3206_s18, 16  ;;  %s1914_s30 = int_to_ptr.vmem [resolvable:$true] %s1913_s30 }
 0x408   : > { %p2460_p6 = scmp.lt.s32.totalorder %s2458_s27, %s2454_s1 }
 0x40a   : > { %p2461_p7 = por %p2460_p6, %p2459_p5 }
 0x40b   : > { %1859 = vmatpush.bf16.msrb.mxu1 %v2146_v13 }
 0x40c   : > { %p2462_p9 = pnand %p2461_p7, %p2457_p3 }
 0x460   : > { %v1682_v38 = vpop.permute.xlu2 %1681 }
 0x476   : > { %v1686_v27 = vpop.permute.xlu1 %1685 }
 0x478   : > { %v1678_v52 = vpop.permute.xlu0 %1677 }
 0x479   : > { %v1689_v39 = vsel %vm882_vm3, %v1669_v30, %v1678_v52 }
 0x47a   : > { %v1691_v33 = vsel %vm1690_vm7, %v1689_v39, %v1682_v38 }
 0x47b   : > { %v1693_v37 = vsel %vm1692_vm8, %v1691_v33, %v1686_v27 }
 0x47c   : > { %v1695_v17 = vpack.c.bf16 %v1693_v37, %v1693_v37 }
 0x47e   : > { %2105 = vmatmul.msk.bf16.vlgmr.msra.gmra.mxu3 %vm725_vm0, %v1695_v17 }
 0x501   : > { %v1729_v23 = vpop.f32.mrf.mxu3 }
 0x502   : > { %v1730_v41 = vadd.f32 %v2281_v20, %v1729_v23 }
 0x504   : > { %v1733_v18 = vadd.f32 %v1730_v41, %v1694_v40  ;;  %v2286_v41 = vld [vmem:[%s3205_s6] ss:$0 sm:$0xff] }
 0x506   : > { %v1736_v22 = vsel %vm725_vm0, %v1733_v18, 0.0 }
 0x507   : > { %1737 = vadd.xlane.f32.xlu0 %v1736_v22 }
 0x509   : > { %v1731_v24 = vpop.f32.mrf.mxu3 }
 0x50a   : > { %v2287_v24 = vld [vmem:[%s3208_s22] ss:$0 sm:$0xff] }
 0x57a   : > { %v1738_v49 = vpop.xlane.xlu0 %1737 }
 0x57b   : > { %v1746_v26 = vmul.f32 %v1745_v48, %v1738_v49 }
 0x57d   : > { %v1747_v50 = vsub.f32 %v1733_v18, %v1746_v26 }
 0x57f   : > { %v1748_v51 = vmul.f32 %v1747_v50, %v1747_v50 }
 0x581   : > { %v1749_v53 = vsel %vm725_vm0, %v1748_v51, 0.0 }
 0x582   : > { %1750 = vadd.xlane.f32.xlu2 %v1749_v53 }
 0x5f5   : > { %v1751_v57 = vpop.xlane.xlu2 %1750 }
 0x5f6   : > { %v1752_v58 = vmul.f32 %v1751_v57, %v1745_v48 }
 0x5f8   : > { %v1753_v60 = vadd.f32 1e-05, %v1752_v58 }
 0x5fa   : > { %2314 = vrsqrt.f32 %v1753_v60  ;;  %vm1760_vm11 = vweird.f32 %v1753_v60 }
 0x600   : > { %v2315_v62 = vpop.eup %2314 }
 0x601   : > { %v1755_v63 = vmul.f32 %v2315_v62, %v1753_v60  ;;  %vm1761_vm10 = vweird.f32 %v2315_v62 }
 0x602   : > { %vm1762_vm12 = vmor %vm1760_vm11, %vm1761_vm10 }
 0x603   : > { %v1756_v1 = vmul.f32 %v2315_v62, %v1755_v63 }
 0x605   : > { %v1757_v2 = vmul.f32 0.5, %v1756_v1 }
 0x607   : > { %v1758_v3 = vsub.f32 1.5, %v1757_v2 }
 0x609   : > { %v1759_v5 = vmul.f32 %v2315_v62, %v1758_v3 }
 0x60b   : > { %v1763_v7 = vsel %vm1762_vm12, %v2315_v62, %v1759_v5 }
 0x60c   : > { %v1764_v10 = vmul.f32 %v1763_v7, %v1747_v50 }
 0x60e   : > { %v1768_v11 = vmul.f32 %v2282_v6, %v1764_v10 }
 0x610   : > { %v1772_v12 = vadd.f32 %v2283_v9, %v1768_v11 }
 0x612   : > { %v1773_v4 = vpack.c.bf16 %v1772_v12, %v1772_v12 }
 0x614   : > { %2114 = vmatmul.msk.bf16.vlgmr.msrb.gmra.mxu0 %vm725_vm0, %v1773_v4 }
 0x691   : > { %v1806_v15 = vpop.f32.mrf.mxu0 }
 0x692   : > { %v1807_v16 = vadd.f32 %v2284_v14, %v1806_v15 }
 0x694   : > { %v1810_v19 = vmax.f32 %v1807_v16, 0.0 }
 0x696   : > { %v1811_v21 = vpack.c.bf16 %v1810_v19, %v1810_v19 }
 0x698   : > { %2131 = vmatmul.msk.bf16.vlgmr.msrb.gmra.mxu1 %vm1848_vm13, %v1811_v21 }
 0x699   : > { %v1808_v61 = vpop.f32.mrf.mxu0 }
 0x715   : > { %v1861_v28 = vpop.f32.mrf.mxu1 }
 0x716   : > { %v1862_v25 = vadd.f32 %v2285_v35, %v1861_v28 }
 0x718   : > { %v1865_v32 = vadd.f32 %v1862_v25, %v1772_v12 }
 0x71a   : > { %v1868_v36 = vsel %vm725_vm0, %v1865_v32, 0.0 }
 0x71b   : > { %1869 = vadd.xlane.f32.xlu1 %v1868_v36 }
 0x71d   : > { %v1863_v8 = vpop.f32.mrf.mxu1 }
 0x78e   : > { %v1870_v29 = vpop.xlane.xlu1 %1869 }
 0x78f   : > { %v1871_v30 = vmul.f32 %v1870_v29, %v1745_v48 }
 0x791   : > { %v1872_v31 = vsub.f32 %v1865_v32, %v1871_v30 }
 0x793   : > { %v1873_v34 = vmul.f32 %v1872_v31, %v1872_v31 }
 0x795   : > { %v1874_v52 = vsel %vm725_vm0, %v1873_v34, 0.0 }
 0x796   : > { %1875 = vadd.xlane.f32.xlu0 %v1874_v52 }
 0x809   : > { %v1876_v38 = vpop.xlane.xlu0 %1875 }
 0x80a   : > { %v1877_v39 = vmul.f32 %v1876_v38, %v1745_v48 }
 0x80c   : > { %v1878_v27 = vadd.f32 1e-05, %v1877_v39 }
 0x80e   : > { %2316 = vrsqrt.f32 %v1878_v27  ;;  %vm1885_vm15 = vweird.f32 %v1878_v27 }
 0x814   : > { %v2317_v33 = vpop.eup %2316 }
 0x815   : > { %v1880_v37 = vmul.f32 %v2317_v33, %v1878_v27  ;;  %vm1886_vm14 = vweird.f32 %v2317_v33 }
 0x816   : > { %vm1887_vm1 = vmor %vm1885_vm15, %vm1886_vm14 }
 0x817   : > { %v1881_v17 = vmul.f32 %v2317_v33, %v1880_v37 }
 0x819   : > { %v1882_v20 = vmul.f32 0.5, %v1881_v17 }
 0x81b   : > { %v1883_v23 = vsub.f32 1.5, %v1882_v20 }
 0x81d   : > { %v1884_v40 = vmul.f32 %v2317_v33, %v1883_v23 }
 0x81f   : > { %v1888_v18 = vsel %vm1887_vm1, %v2317_v33, %v1884_v40 }
 0x820   : > { %v1889_v22 = vmul.f32 %v1888_v18, %v1872_v31 }
 0x822   : > { %v1893_v42 = vmul.f32 %v2286_v41, %v1889_v22 }
 0x824   : > { %v1897_v43 = vadd.f32 %v2287_v24, %v1893_v42 }
 0x826   : > { %1898 = vst.msk [vmem:[%s683_s20] sm:$0xff] %vm725_vm0, %v1897_v43 }
 0x827   : > { %2465 = shalt.err (!%p2462_p9)
}
 0x828   : > { %2166 = dma.vmem_to_hbm [thread:$0]  (%p2683_p4), %s1914_s30, 128, %s1916_s23, %s1900_s0  }
 0x829 PF: > { %s3209_s29 = sld [smem:[#allocation23_spill]] }
 0x82a   : > { %s3210_s28 = sld [smem:[#allocation19_spill]] }
 0x82f   : > { %p2193_p10 = scmp.ge.s32.totalorder %s3209_s29, 2 }
 0x830   : > { %s1927_s26 = sand.u32 1, %s3210_s28  }
 0x831   : > { %p2182_p11 = pnand %p2193_p10, %p2690_p8  ;;  %s1928_s22 = scalar_lea.sflag [#allocation8], %s1927_s26 }
 0x833   : > { %p2183_p12 = pneg %p2182_p11 }
 0x835   : > { %2503 = dma.done.wait (%p2183_p12), %s1928_s22, 128  }
 0x836   : > { %2505 = vsyncadd (%p2183_p12), %s1928_s22, 4294967168  ;;  %s34_s19 = sadd.s32 1, %s3209_s29   ;;  %s3212_s27 = sld [smem:[#allocation20_spill]] }
 0x837   : > { %p31_p13 = scmp.ge.s32.totalorder %s34_s19, 4   ;;  %s3213_s28 = sld [smem:[#allocation21_spill]] }
 0x838   : > { %s3214_s29 = sld [smem:[#allocation27_spill]] }
 0x839   : > { %s3215_s30 = sld [smem:[#allocation22_spill]]  ;;  %33 = sbr.rel (!%p31_p13) target bundleno = 15 (0xf), region = 159 }
 0x83a   : > { %s3216_s0 = sld [smem:[#allocation24_spill]] }
 0x83e   :  { %1934 = vsyncpa [#allocation7], 1 }
 0x83f   :  { %1936 = vsyncpa [#allocation7 + $0x1], 1 }
 0x840   :  { %1937 = vsyncpa [#allocation10], 1 }
 0x841   :  { %1938 = vsyncpa [#allocation13], 1 }
 0x842   :  { %1939 = vsyncpa [#allocation8], 1 }
 0x843   :  { %1941 = vsyncpa [#allocation8 + $0x1], 1 }

</bundles_post_ra>
